<compile_context>
chip_gen: v6e
topology: v6e:2x2x1
jax: 0.10.0
libtpu: 0.0.40
codegen_flags: <defaults>
</compile_context>

<pallas_src>
import numpy as np
import jax
import jax.numpy as jnp
from jax.experimental import pallas as pl
from jax.experimental.pallas import tpu as pltpu

# ---------------- configuration (small, consistent with the module) ----------------
B, C, H, W = 2, 4, 16, 16
F = 8                        # feature-layer output channels
KH = KW = 3
HW = H * W                   # 256  spatial positions per image
N_FEAT = F * HW              # 2048 flattened feature dim after view(B, -1)
N_TREE = 4
DEPTH = 3
N_LEAF = 2 ** DEPTH          # 8 leaves; decision linear outputs N_LEAF units (index 0 unused)
TL = N_TREE * N_LEAF         # 32   all trees' leaves stacked on the lane axis
N_NODE = N_LEAF - 1          # 7 internal nodes (heap index 1..7)
N_USED = 256                 # features selected per tree
N_CLASS = 10

BPAD = 8                     # batch rows padded to one full sublane tile
N_TAP = KH * KW              # 9 conv taps
BIAS_ROWS = 8                # ones block appended to the im2col matrix (bias fold, keeps K a mult. of 8)
K_IM = N_TAP * B * C + BIAS_ROWS   # 80
NODE_PAD = 128               # per-node routing block padded to one vreg lane width

# static lane shift of the source pixel for each conv tap (di, dj)
TAP_SHIFTS = tuple((di - 1) * W + (dj - 1) for di in range(KH) for dj in range(KW))


# ---------------- the single fused Pallas kernel -----------------------------------
def _shift_lanes(v, s):
    # out[:, q] = v[:, (q + s) % n]  for a static shift s (wrap-around is masked out later)
    n = v.shape[-1]
    s = s % n
    if s == 0:
        return v
    return jnp.concatenate([v[:, s:], v[:, :s]], axis=1)


def ndf_kernel(x_ref, mask_ref, wc_ref, wd_ref, bd_ref, s_ref, c_ref, pi_ref, o_ref):
    # x_ref   : (B*C, HW)            input images, one (b, c) plane per row
    # mask_ref: (N_TAP, HW)          tap validity masks (zero where 3x3 window leaves the image)
    # wc_ref  : (F*BPAD, K_IM)       batch-block-diagonal conv weight, conv bias folded in
    # wd_ref  : (F, HW, TL)          decision weights scattered to channel-major feature layout
    # bd_ref  : (1, TL)              stacked decision biases
    # s_ref   : (TL, N_NODE*128)     routing select/scale matrix (lane-padded per node)
    # c_ref   : (1, N_NODE*128)      routing offsets (neutral 1 in the padding)
    # pi_ref  : (128, N_CLASS)       softmax(pi)/N_TREE, rows >= TL are zero
    # o_ref   : (B, N_CLASS)

    # --- conv 3x3 pad=1 (+ bias) + ReLU: masked lane shifts -> one MXU matmul ---
    x = x_ref[...]                                                    # (8, 256)
    taps = [_shift_lanes(x, TAP_SHIFTS[t]) * mask_ref[t:t + 1, :] for t in range(N_TAP)]
    taps.append(jnp.ones((BIAS_ROWS, HW), jnp.float32))               # bias rows (fold conv bias)
    im = jnp.concatenate(taps, axis=0)                                # (K_IM, HW) = (80, 256)
    conv = jnp.dot(wc_ref[...], im, preferred_element_type=jnp.float32)   # (F*BPAD, HW)
    conv = jnp.maximum(conv, 0.0)                                     # row f*BPAD + b = conv[b, f, :]

    # --- all trees' decision units: 8 channel-blocked matmuls, then sigmoid ---
    dec = jnp.zeros((BPAD, TL), jnp.float32)
    for f in range(F):
        xf = conv[f * BPAD:(f + 1) * BPAD, :]                         # (8, 256) sublane-aligned slice
        dec = dec + jnp.dot(xf, wd_ref[f], preferred_element_type=jnp.float32)
    d = jax.nn.sigmoid(dec + bd_ref[...])                             # (8, TL)

    # --- routing: one select matmul, then a balanced 3-deep product over 7 nodes ---
    terms = jnp.dot(d, s_ref[...], preferred_element_type=jnp.float32) + c_ref[...]   # (8, 7*128)
    f1 = terms[:, 0 * NODE_PAD:1 * NODE_PAD]
    f2 = terms[:, 1 * NODE_PAD:2 * NODE_PAD]
    f3 = terms[:, 2 * NODE_PAD:3 * NODE_PAD]
    f4 = terms[:, 3 * NODE_PAD:4 * NODE_PAD]
    f5 = terms[:, 4 * NODE_PAD:5 * NODE_PAD]
    f6 = terms[:, 5 * NODE_PAD:6 * NODE_PAD]
    f7 = terms[:, 6 * NODE_PAD:7 * NODE_PAD]
    mu = ((f1 * f2) * (f3 * f4)) * ((f5 * f6) * f7)                   # (8, 128); lanes >= TL equal 1

    # --- leaf -> class, summed over trees (softmax(pi)/N_TREE precomputed, pad rows are 0) ---
    out = jnp.dot(mu, pi_ref[...], preferred_element_type=jnp.float32)    # (8, N_CLASS)
    o_ref[...] = out[:B, :]                                           # drop the padded batch rows


def neural_decision_forest(x, prep):
    x2 = x.reshape(B * C, HW)      # layout-preserving; the only per-call XLA glue
    return pl.pallas_call(
        ndf_kernel,
        out_shape=jax.ShapeDtypeStruct((B, N_CLASS), jnp.float32),
        grid=(1,),                 # whole problem is a single grid step (everything fits VMEM)
        in_specs=[
            pl.BlockSpec((B * C, HW), lambda i: (0, 0)),
            pl.BlockSpec((N_TAP, HW), lambda i: (0, 0)),
            pl.BlockSpec((F * BPAD, K_IM), lambda i: (0, 0)),
            pl.BlockSpec((F, HW, TL), lambda i: (0, 0, 0)),
            pl.BlockSpec((1, TL), lambda i: (0, 0)),
            pl.BlockSpec((TL, N_NODE * NODE_PAD), lambda i: (0, 0)),
            pl.BlockSpec((1, N_NODE * NODE_PAD), lambda i: (0, 0)),
            pl.BlockSpec((NODE_PAD, N_CLASS), lambda i: (0, 0)),
        ],
        out_specs=pl.BlockSpec((B, N_CLASS), lambda i: (0, 0)),
        compiler_params=pltpu.CompilerParams(dimension_semantics=("arbitrary",)),
    )(x2, prep["masks"], prep["wc"], prep["wd"], prep["bd"],
      prep["s_route"], prep["c_route"], prep["pi"])


# ---------------- one-time host-side parameter prep (hoisted out of the forward) ----
def build_routing_masks():
    left = np.zeros((N_LEAF, N_LEAF), np.float32)    # [node, leaf]: leaf goes left at node
    right = np.zeros((N_LEAF, N_LEAF), np.float32)   # [node, leaf]: leaf goes right at node
    for node in range(1, N_LEAF):
        k = int(np.floor(np.log2(node)))             # tree layer of this node
        p = node - 2 ** k                            # position within layer
        for leaf in range(N_LEAF):
            if (leaf >> (DEPTH - k)) == p:           # leaf's path passes through this node
                bit = (leaf >> (DEPTH - 1 - k)) & 1
                if bit == 0:
                    left[node, leaf] = 1.0
                else:
                    right[node, leaf] = 1.0
    return left, right


def prepare_params(params):
    w_conv = np.asarray(params["w_conv"], np.float32)    # (F, C, 3, 3)
    b_conv = np.asarray(params["b_conv"], np.float32)    # (F,)
    w_tree = np.asarray(params["w_tree"], np.float32)    # (N_TREE, N_USED, N_LEAF)
    b_tree = np.asarray(params["b_tree"], np.float32)    # (N_TREE, 1, N_LEAF)
    pi_tree = np.asarray(params["pi_tree"], np.float32)  # (N_TREE, N_LEAF, N_CLASS)
    feat_idx = np.asarray(params["feat_idx"])            # (N_TREE, N_USED), unique per row

    # Tap validity masks: zero wherever the 3x3 window reads outside the image.
    masks = np.zeros((N_TAP, HW), np.float32)
    for di in range(KH):
        for dj in range(KW):
            t = di * KW + dj
            for h in range(H):
                for w in range(W):
                    hs, ws = h + di - 1, w + dj - 1
                    if 0 <= hs < H and 0 <= ws < W:
                        masks[t, h * W + w] = 1.0

    # Batch-block-diagonal conv weight; bias folded into column N_TAP*B*C (the ones block).
    wc = np.zeros((F * BPAD, K_IM), np.float32)
    for f in range(F):
        for b in range(B):
            r = f * BPAD + b
            for t in range(N_TAP):
                di, dj = divmod(t, KW)
                wc[r, t * B * C + b * C:t * B * C + (b + 1) * C] = w_conv[f, :, di, dj]
            wc[r, N_TAP * B * C] = b_conv[f]

    # Decision weights: scatter each tree's selected features into the channel-major
    # flattened feature layout (feat_idx rows are permutations -> no collisions).
    wd = np.zeros((N_FEAT, TL), np.float32)
    for t in range(N_TREE):
        wd[feat_idx[t], t * N_LEAF:(t + 1) * N_LEAF] += w_tree[t]
    wd = wd.reshape(F, HW, TL)
    bd = b_tree.reshape(1, TL)

    # Routing tables; each node block padded to 128 lanes with neutral values (s=0, c=1)
    # so every per-node factor is a whole vreg.  Factor(node, leaf) = d*s + c.
    left, right = build_routing_masks()
    a = left - right
    c0 = 1.0 - left
    s_route = np.zeros((TL, N_NODE * NODE_PAD), np.float32)
    c_route = np.ones((1, N_NODE * NODE_PAD), np.float32)
    for node in range(1, N_LEAF):
        for t in range(N_TREE):
            for l in range(N_LEAF):
                col = (node - 1) * NODE_PAD + t * N_LEAF + l
                s_route[t * N_LEAF + node, col] = a[node, l]
                c_route[0, col] = c0[node, l]

    # Leaf class distributions: softmax over classes with the 1/N_TREE mean folded in,
    # rows padded to 128 with zeros (so the mu padding lanes contribute nothing).
    e = np.exp(pi_tree - pi_tree.max(axis=-1, keepdims=True))
    sm = e / e.sum(axis=-1, keepdims=True)
    pi = np.zeros((NODE_PAD, N_CLASS), np.float32)
    pi[:TL] = sm.reshape(TL, N_CLASS) / N_TREE

    prep = dict(masks=masks, wc=wc, wd=wd, bd=bd,
                s_route=s_route, c_route=c_route, pi=pi)
    return {k: jnp.asarray(v) for k, v in prep.items()}


# ---------------- pure-JAX reference (torch-style routing) for correctness ----------
def reference_forward(x, params):
    conv = jax.lax.conv_general_dilated(
        x, params["w_conv"], (1, 1), "SAME",
        dimension_numbers=("NCHW", "OIHW", "NCHW"))
    conv = jnp.maximum(conv + params["b_conv"][None, :, None, None], 0.0)
    feat = conv.reshape(B, -1)
    probs = []
    for t in range(N_TREE):
        f = feat[:, params["feat_idx"][t]]
        d = jax.nn.sigmoid(f @ params["w_tree"][t] + params["b_tree"][t])   # (B, N_LEAF)
        dec = jnp.stack([d, 1.0 - d], axis=2)                               # (B, N_LEAF, 2)
        mu = jnp.ones((B, 1, 1), jnp.float32)
        begin, end = 1, 2
        for layer in range(DEPTH):
            mu = jnp.tile(mu.reshape(B, -1, 1), (1, 1, 2))
            mu = mu * dec[:, begin:end, :]
            begin = end
            end = begin + 2 ** (layer + 1)
        mu = mu.reshape(B, N_LEAF)
        pi = jax.nn.softmax(params["pi_tree"][t], axis=-1)
        probs.append(mu @ pi)
    return jnp.mean(jnp.stack(probs, axis=0), axis=0)


if __name__ == "__main__":
    key = jax.random.PRNGKey(0)
    k_x, k_wc, k_bc, k_wt, k_bt, k_pi = jax.random.split(key, 6)

    x = jax.random.normal(k_x, (B, C, H, W), jnp.float32)

    feat_idx = jnp.asarray(
        np.stack([np.random.RandomState(1234 + t).permutation(N_FEAT)[:N_USED]
                  for t in range(N_TREE)]).astype(np.int32))

    params = dict(
        w_conv=jax.random.normal(k_wc, (F, C, KH, KW), jnp.float32) * 0.1,
        b_conv=jax.random.normal(k_bc, (F,), jnp.float32) * 0.1,
        w_tree=jax.random.normal(k_wt, (N_TREE, N_USED, N_LEAF), jnp.float32) * 0.05,
        b_tree=jax.random.normal(k_bt, (N_TREE, 1, N_LEAF), jnp.float32) * 0.05,
        pi_tree=jax.random.normal(k_pi, (N_TREE, N_LEAF, N_CLASS), jnp.float32) * 0.5,
        feat_idx=feat_idx,
    )

    prep = prepare_params(params)            # one-time, parameter-only prep (not in the forward path)

    fwd = jax.jit(neural_decision_forest)
    out = jax.block_until_ready(fwd(x, prep))
    ref = jax.block_until_ready(reference_forward(x, params))

    assert out.shape == (B, N_CLASS)
    np.testing.assert_allclose(np.asarray(out), np.asarray(ref), rtol=2e-5, atol=2e-5)
    print("KERNEL_OK")
</pallas_src>

<mosaic_0001>
module attributes {stable_mosaic.version = 11 : i64} {
  func.func @ndf_kernel(%arg0: i32, %arg1: memref<8x256xf32, #tpu.memory_space<vmem>>, %arg2: memref<9x256xf32, #tpu.memory_space<vmem>>, %arg3: memref<64x80xf32, #tpu.memory_space<vmem>>, %arg4: memref<8x256x32xf32, #tpu.memory_space<vmem>>, %arg5: memref<1x32xf32, #tpu.memory_space<vmem>>, %arg6: memref<32x896xf32, #tpu.memory_space<vmem>>, %arg7: memref<1x896xf32, #tpu.memory_space<vmem>>, %arg8: memref<128x10xf32, #tpu.memory_space<vmem>>, %arg9: memref<2x10xf32, #tpu.memory_space<vmem>>) attributes {dimension_semantics = [#tpu.dimension_semantics<arbitrary>], iteration_bounds = array<i64: 1>, scalar_prefetch = 0 : i64, scratch_operands = 0 : i64, tpu.core_type = #tpu.core_type<tc>, window_params = [{pipeline_mode = #tpu.pipeline_mode<synchronous>, transform_indices = @transform_0, window_bounds = array<i64: 8, 256>}, {pipeline_mode = #tpu.pipeline_mode<synchronous>, transform_indices = @transform_1, window_bounds = array<i64: 9, 256>}, {pipeline_mode = #tpu.pipeline_mode<synchronous>, transform_indices = @transform_2, window_bounds = array<i64: 64, 80>}, {pipeline_mode = #tpu.pipeline_mode<synchronous>, transform_indices = @transform_3, window_bounds = array<i64: 8, 256, 32>}, {pipeline_mode = #tpu.pipeline_mode<synchronous>, transform_indices = @transform_4, window_bounds = array<i64: 1, 32>}, {pipeline_mode = #tpu.pipeline_mode<synchronous>, transform_indices = @transform_5, window_bounds = array<i64: 32, 896>}, {pipeline_mode = #tpu.pipeline_mode<synchronous>, transform_indices = @transform_6, window_bounds = array<i64: 1, 896>}, {pipeline_mode = #tpu.pipeline_mode<synchronous>, transform_indices = @transform_7, window_bounds = array<i64: 128, 10>}, {pipeline_mode = #tpu.pipeline_mode<synchronous>, transform_indices = @transform_8, window_bounds = array<i64: 2, 10>}]} {
    %c0 = arith.constant 0 : index
    %c0_0 = arith.constant 0 : index
    %0 = vector.load %arg1[%c0, %c0_0] : memref<8x256xf32, #tpu.memory_space<vmem>>, vector<8x256xf32>
    %1 = vector.extract_strided_slice %0 {offsets = [0, 239], sizes = [8, 17], strides = [1, 1]} : vector<8x256xf32> to vector<8x17xf32>
    %2 = vector.extract_strided_slice %0 {offsets = [0, 0], sizes = [8, 239], strides = [1, 1]} : vector<8x256xf32> to vector<8x239xf32>
    %3 = tpu.concatenate %1, %2 in 1 : vector<8x17xf32>, vector<8x239xf32> -> vector<8x256xf32>
    %c0_1 = arith.constant 0 : index
    %c0_2 = arith.constant 0 : index
    %4 = vector.load %arg2[%c0_1, %c0_2] : memref<9x256xf32, #tpu.memory_space<vmem>>, vector<1x256xf32>
    %5 = vector.broadcast %4 : vector<1x256xf32> to vector<8x256xf32>
    %6 = arith.mulf %3, %5 : vector<8x256xf32>
    %7 = vector.extract_strided_slice %0 {offsets = [0, 240], sizes = [8, 16], strides = [1, 1]} : vector<8x256xf32> to vector<8x16xf32>
    %8 = vector.extract_strided_slice %0 {offsets = [0, 0], sizes = [8, 240], strides = [1, 1]} : vector<8x256xf32> to vector<8x240xf32>
    %9 = tpu.concatenate %7, %8 in 1 : vector<8x16xf32>, vector<8x240xf32> -> vector<8x256xf32>
    %c1 = arith.constant 1 : index
    %c0_3 = arith.constant 0 : index
    %10 = vector.load %arg2[%c1, %c0_3] : memref<9x256xf32, #tpu.memory_space<vmem>>, vector<1x256xf32>
    %11 = vector.broadcast %10 : vector<1x256xf32> to vector<8x256xf32>
    %12 = arith.mulf %9, %11 : vector<8x256xf32>
    %13 = vector.extract_strided_slice %0 {offsets = [0, 241], sizes = [8, 15], strides = [1, 1]} : vector<8x256xf32> to vector<8x15xf32>
    %14 = vector.extract_strided_slice %0 {offsets = [0, 0], sizes = [8, 241], strides = [1, 1]} : vector<8x256xf32> to vector<8x241xf32>
    %15 = tpu.concatenate %13, %14 in 1 : vector<8x15xf32>, vector<8x241xf32> -> vector<8x256xf32>
    %c2 = arith.constant 2 : index
    %c0_4 = arith.constant 0 : index
    %16 = vector.load %arg2[%c2, %c0_4] : memref<9x256xf32, #tpu.memory_space<vmem>>, vector<1x256xf32>
    %17 = vector.broadcast %16 : vector<1x256xf32> to vector<8x256xf32>
    %18 = arith.mulf %15, %17 : vector<8x256xf32>
    %19 = vector.extract_strided_slice %0 {offsets = [0, 255], sizes = [8, 1], strides = [1, 1]} : vector<8x256xf32> to vector<8x1xf32>
    %20 = vector.extract_strided_slice %0 {offsets = [0, 0], sizes = [8, 255], strides = [1, 1]} : vector<8x256xf32> to vector<8x255xf32>
    %21 = tpu.concatenate %19, %20 in 1 : vector<8x1xf32>, vector<8x255xf32> -> vector<8x256xf32>
    %c3 = arith.constant 3 : index
    %c0_5 = arith.constant 0 : index
    %22 = vector.load %arg2[%c3, %c0_5] : memref<9x256xf32, #tpu.memory_space<vmem>>, vector<1x256xf32>
    %23 = vector.broadcast %22 : vector<1x256xf32> to vector<8x256xf32>
    %24 = arith.mulf %21, %23 : vector<8x256xf32>
    %c4 = arith.constant 4 : index
    %c0_6 = arith.constant 0 : index
    %25 = vector.load %arg2[%c4, %c0_6] : memref<9x256xf32, #tpu.memory_space<vmem>>, vector<1x256xf32>
    %26 = vector.broadcast %25 : vector<1x256xf32> to vector<8x256xf32>
    %27 = arith.mulf %0, %26 : vector<8x256xf32>
    %28 = vector.extract_strided_slice %0 {offsets = [0, 1], sizes = [8, 255], strides = [1, 1]} : vector<8x256xf32> to vector<8x255xf32>
    %29 = vector.extract_strided_slice %0 {offsets = [0, 0], sizes = [8, 1], strides = [1, 1]} : vector<8x256xf32> to vector<8x1xf32>
    %30 = tpu.concatenate %28, %29 in 1 : vector<8x255xf32>, vector<8x1xf32> -> vector<8x256xf32>
    %c5 = arith.constant 5 : index
    %c0_7 = arith.constant 0 : index
    %31 = vector.load %arg2[%c5, %c0_7] : memref<9x256xf32, #tpu.memory_space<vmem>>, vector<1x256xf32>
    %32 = vector.broadcast %31 : vector<1x256xf32> to vector<8x256xf32>
    %33 = arith.mulf %30, %32 : vector<8x256xf32>
    %34 = vector.extract_strided_slice %0 {offsets = [0, 15], sizes = [8, 241], strides = [1, 1]} : vector<8x256xf32> to vector<8x241xf32>
    %35 = vector.extract_strided_slice %0 {offsets = [0, 0], sizes = [8, 15], strides = [1, 1]} : vector<8x256xf32> to vector<8x15xf32>
    %36 = tpu.concatenate %34, %35 in 1 : vector<8x241xf32>, vector<8x15xf32> -> vector<8x256xf32>
    %c6 = arith.constant 6 : index
    %c0_8 = arith.constant 0 : index
    %37 = vector.load %arg2[%c6, %c0_8] : memref<9x256xf32, #tpu.memory_space<vmem>>, vector<1x256xf32>
    %38 = vector.broadcast %37 : vector<1x256xf32> to vector<8x256xf32>
    %39 = arith.mulf %36, %38 : vector<8x256xf32>
    %40 = vector.extract_strided_slice %0 {offsets = [0, 16], sizes = [8, 240], strides = [1, 1]} : vector<8x256xf32> to vector<8x240xf32>
    %41 = vector.extract_strided_slice %0 {offsets = [0, 0], sizes = [8, 16], strides = [1, 1]} : vector<8x256xf32> to vector<8x16xf32>
    %42 = tpu.concatenate %40, %41 in 1 : vector<8x240xf32>, vector<8x16xf32> -> vector<8x256xf32>
    %c7 = arith.constant 7 : index
    %c0_9 = arith.constant 0 : index
    %43 = vector.load %arg2[%c7, %c0_9] : memref<9x256xf32, #tpu.memory_space<vmem>>, vector<1x256xf32>
    %44 = vector.broadcast %43 : vector<1x256xf32> to vector<8x256xf32>
    %45 = arith.mulf %42, %44 : vector<8x256xf32>
    %46 = vector.extract_strided_slice %0 {offsets = [0, 17], sizes = [8, 239], strides = [1, 1]} : vector<8x256xf32> to vector<8x239xf32>
    %47 = vector.extract_strided_slice %0 {offsets = [0, 0], sizes = [8, 17], strides = [1, 1]} : vector<8x256xf32> to vector<8x17xf32>
    %48 = tpu.concatenate %46, %47 in 1 : vector<8x239xf32>, vector<8x17xf32> -> vector<8x256xf32>
    %c8 = arith.constant 8 : index
    %c0_10 = arith.constant 0 : index
    %49 = vector.load %arg2[%c8, %c0_10] : memref<9x256xf32, #tpu.memory_space<vmem>>, vector<1x256xf32>
    %50 = vector.broadcast %49 : vector<1x256xf32> to vector<8x256xf32>
    %51 = arith.mulf %48, %50 : vector<8x256xf32>
    %cst = arith.constant 1.000000e+00 : f32
    %52 = vector.broadcast %cst : f32 to vector<8x256xf32>
    %53 = tpu.concatenate %6, %12, %18, %24, %27, %33, %39, %45, %51, %52 in 0 : vector<8x256xf32>, vector<8x256xf32>, vector<8x256xf32>, vector<8x256xf32>, vector<8x256xf32>, vector<8x256xf32>, vector<8x256xf32>, vector<8x256xf32>, vector<8x256xf32>, vector<8x256xf32> -> vector<80x256xf32>
    %c0_11 = arith.constant 0 : index
    %c0_12 = arith.constant 0 : index
    %54 = vector.load %arg3[%c0_11, %c0_12] : memref<64x80xf32, #tpu.memory_space<vmem>>, vector<64x80xf32>
    %cst_13 = arith.constant dense<0.000000e+00> : vector<64x256xf32>
    %55 = tpu.matmul %54, %53, %cst_13 {dimension_numbers = #tpu.dot_dimension_numbers<[1], [0], [0], [1], [0, 0, 1, 1], [], []>} : vector<64x80xf32>, vector<80x256xf32>, vector<64x256xf32> -> vector<64x256xf32>
    %cst_14 = arith.constant 0.000000e+00 : f32
    %56 = vector.broadcast %cst_14 : f32 to vector<64x256xf32>
    %57 = arith.maximumf %55, %56 : vector<64x256xf32>
    %cst_15 = arith.constant 0.000000e+00 : f32
    %58 = vector.broadcast %cst_15 : f32 to vector<8x32xf32>
    %59 = vector.extract_strided_slice %57 {offsets = [0, 0], sizes = [8, 256], strides = [1, 1]} : vector<64x256xf32> to vector<8x256xf32>
    %c0_16 = arith.constant 0 : index
    %c0_17 = arith.constant 0 : index
    %c0_18 = arith.constant 0 : index
    %60 = vector.load %arg4[%c0_16, %c0_17, %c0_18] : memref<8x256x32xf32, #tpu.memory_space<vmem>>, vector<1x256x32xf32>
    %61 = vector.shape_cast %60 : vector<1x256x32xf32> to vector<256x32xf32>
    %cst_19 = arith.constant dense<0.000000e+00> : vector<8x32xf32>
    %62 = tpu.matmul %59, %61, %cst_19 {dimension_numbers = #tpu.dot_dimension_numbers<[1], [0], [0], [1], [0, 0, 1, 1], [], []>} : vector<8x256xf32>, vector<256x32xf32>, vector<8x32xf32> -> vector<8x32xf32>
    %63 = arith.addf %58, %62 : vector<8x32xf32>
    %64 = vector.extract_strided_slice %57 {offsets = [8, 0], sizes = [8, 256], strides = [1, 1]} : vector<64x256xf32> to vector<8x256xf32>
    %c1_20 = arith.constant 1 : index
    %c0_21 = arith.constant 0 : index
    %c0_22 = arith.constant 0 : index
    %65 = vector.load %arg4[%c1_20, %c0_21, %c0_22] : memref<8x256x32xf32, #tpu.memory_space<vmem>>, vector<1x256x32xf32>
    %66 = vector.shape_cast %65 : vector<1x256x32xf32> to vector<256x32xf32>
    %cst_23 = arith.constant dense<0.000000e+00> : vector<8x32xf32>
    %67 = tpu.matmul %64, %66, %cst_23 {dimension_numbers = #tpu.dot_dimension_numbers<[1], [0], [0], [1], [0, 0, 1, 1], [], []>} : vector<8x256xf32>, vector<256x32xf32>, vector<8x32xf32> -> vector<8x32xf32>
    %68 = arith.addf %63, %67 : vector<8x32xf32>
    %69 = vector.extract_strided_slice %57 {offsets = [16, 0], sizes = [8, 256], strides = [1, 1]} : vector<64x256xf32> to vector<8x256xf32>
    %c2_24 = arith.constant 2 : index
    %c0_25 = arith.constant 0 : index
    %c0_26 = arith.constant 0 : index
    %70 = vector.load %arg4[%c2_24, %c0_25, %c0_26] : memref<8x256x32xf32, #tpu.memory_space<vmem>>, vector<1x256x32xf32>
    %71 = vector.shape_cast %70 : vector<1x256x32xf32> to vector<256x32xf32>
    %cst_27 = arith.constant dense<0.000000e+00> : vector<8x32xf32>
    %72 = tpu.matmul %69, %71, %cst_27 {dimension_numbers = #tpu.dot_dimension_numbers<[1], [0], [0], [1], [0, 0, 1, 1], [], []>} : vector<8x256xf32>, vector<256x32xf32>, vector<8x32xf32> -> vector<8x32xf32>
    %73 = arith.addf %68, %72 : vector<8x32xf32>
    %74 = vector.extract_strided_slice %57 {offsets = [24, 0], sizes = [8, 256], strides = [1, 1]} : vector<64x256xf32> to vector<8x256xf32>
    %c3_28 = arith.constant 3 : index
    %c0_29 = arith.constant 0 : index
    %c0_30 = arith.constant 0 : index
    %75 = vector.load %arg4[%c3_28, %c0_29, %c0_30] : memref<8x256x32xf32, #tpu.memory_space<vmem>>, vector<1x256x32xf32>
    %76 = vector.shape_cast %75 : vector<1x256x32xf32> to vector<256x32xf32>
    %cst_31 = arith.constant dense<0.000000e+00> : vector<8x32xf32>
    %77 = tpu.matmul %74, %76, %cst_31 {dimension_numbers = #tpu.dot_dimension_numbers<[1], [0], [0], [1], [0, 0, 1, 1], [], []>} : vector<8x256xf32>, vector<256x32xf32>, vector<8x32xf32> -> vector<8x32xf32>
    %78 = arith.addf %73, %77 : vector<8x32xf32>
    %79 = vector.extract_strided_slice %57 {offsets = [32, 0], sizes = [8, 256], strides = [1, 1]} : vector<64x256xf32> to vector<8x256xf32>
    %c4_32 = arith.constant 4 : index
    %c0_33 = arith.constant 0 : index
    %c0_34 = arith.constant 0 : index
    %80 = vector.load %arg4[%c4_32, %c0_33, %c0_34] : memref<8x256x32xf32, #tpu.memory_space<vmem>>, vector<1x256x32xf32>
    %81 = vector.shape_cast %80 : vector<1x256x32xf32> to vector<256x32xf32>
    %cst_35 = arith.constant dense<0.000000e+00> : vector<8x32xf32>
    %82 = tpu.matmul %79, %81, %cst_35 {dimension_numbers = #tpu.dot_dimension_numbers<[1], [0], [0], [1], [0, 0, 1, 1], [], []>} : vector<8x256xf32>, vector<256x32xf32>, vector<8x32xf32> -> vector<8x32xf32>
    %83 = arith.addf %78, %82 : vector<8x32xf32>
    %84 = vector.extract_strided_slice %57 {offsets = [40, 0], sizes = [8, 256], strides = [1, 1]} : vector<64x256xf32> to vector<8x256xf32>
    %c5_36 = arith.constant 5 : index
    %c0_37 = arith.constant 0 : index
    %c0_38 = arith.constant 0 : index
    %85 = vector.load %arg4[%c5_36, %c0_37, %c0_38] : memref<8x256x32xf32, #tpu.memory_space<vmem>>, vector<1x256x32xf32>
    %86 = vector.shape_cast %85 : vector<1x256x32xf32> to vector<256x32xf32>
    %cst_39 = arith.constant dense<0.000000e+00> : vector<8x32xf32>
    %87 = tpu.matmul %84, %86, %cst_39 {dimension_numbers = #tpu.dot_dimension_numbers<[1], [0], [0], [1], [0, 0, 1, 1], [], []>} : vector<8x256xf32>, vector<256x32xf32>, vector<8x32xf32> -> vector<8x32xf32>
    %88 = arith.addf %83, %87 : vector<8x32xf32>
    %89 = vector.extract_strided_slice %57 {offsets = [48, 0], sizes = [8, 256], strides = [1, 1]} : vector<64x256xf32> to vector<8x256xf32>
    %c6_40 = arith.constant 6 : index
    %c0_41 = arith.constant 0 : index
    %c0_42 = arith.constant 0 : index
    %90 = vector.load %arg4[%c6_40, %c0_41, %c0_42] : memref<8x256x32xf32, #tpu.memory_space<vmem>>, vector<1x256x32xf32>
    %91 = vector.shape_cast %90 : vector<1x256x32xf32> to vector<256x32xf32>
    %cst_43 = arith.constant dense<0.000000e+00> : vector<8x32xf32>
    %92 = tpu.matmul %89, %91, %cst_43 {dimension_numbers = #tpu.dot_dimension_numbers<[1], [0], [0], [1], [0, 0, 1, 1], [], []>} : vector<8x256xf32>, vector<256x32xf32>, vector<8x32xf32> -> vector<8x32xf32>
    %93 = arith.addf %88, %92 : vector<8x32xf32>
    %94 = vector.extract_strided_slice %57 {offsets = [56, 0], sizes = [8, 256], strides = [1, 1]} : vector<64x256xf32> to vector<8x256xf32>
    %c7_44 = arith.constant 7 : index
    %c0_45 = arith.constant 0 : index
    %c0_46 = arith.constant 0 : index
    %95 = vector.load %arg4[%c7_44, %c0_45, %c0_46] : memref<8x256x32xf32, #tpu.memory_space<vmem>>, vector<1x256x32xf32>
    %96 = vector.shape_cast %95 : vector<1x256x32xf32> to vector<256x32xf32>
    %cst_47 = arith.constant dense<0.000000e+00> : vector<8x32xf32>
    %97 = tpu.matmul %94, %96, %cst_47 {dimension_numbers = #tpu.dot_dimension_numbers<[1], [0], [0], [1], [0, 0, 1, 1], [], []>} : vector<8x256xf32>, vector<256x32xf32>, vector<8x32xf32> -> vector<8x32xf32>
    %98 = arith.addf %93, %97 : vector<8x32xf32>
    %c0_48 = arith.constant 0 : index
    %c0_49 = arith.constant 0 : index
    %99 = vector.load %arg5[%c0_48, %c0_49] : memref<1x32xf32, #tpu.memory_space<vmem>>, vector<1x32xf32>
    %100 = vector.broadcast %99 : vector<1x32xf32> to vector<8x32xf32>
    %101 = arith.addf %98, %100 : vector<8x32xf32>
    %102 = arith.negf %101 : vector<8x32xf32>
    %103 = math.exp %102 : vector<8x32xf32>
    %cst_50 = arith.constant 1.000000e+00 : f32
    %104 = vector.broadcast %cst_50 : f32 to vector<8x32xf32>
    %105 = arith.addf %104, %103 : vector<8x32xf32>
    %106 = arith.divf %104, %105 : vector<8x32xf32>
    %c0_51 = arith.constant 0 : index
    %c0_52 = arith.constant 0 : index
    %107 = vector.load %arg6[%c0_51, %c0_52] : memref<32x896xf32, #tpu.memory_space<vmem>>, vector<32x896xf32>
    %cst_53 = arith.constant dense<0.000000e+00> : vector<8x896xf32>
    %108 = tpu.matmul %106, %107, %cst_53 {dimension_numbers = #tpu.dot_dimension_numbers<[1], [0], [0], [1], [0, 0, 1, 1], [], []>} : vector<8x32xf32>, vector<32x896xf32>, vector<8x896xf32> -> vector<8x896xf32>
    %c0_54 = arith.constant 0 : index
    %c0_55 = arith.constant 0 : index
    %109 = vector.load %arg7[%c0_54, %c0_55] : memref<1x896xf32, #tpu.memory_space<vmem>>, vector<1x896xf32>
    %110 = vector.broadcast %109 : vector<1x896xf32> to vector<8x896xf32>
    %111 = arith.addf %108, %110 : vector<8x896xf32>
    %112 = vector.extract_strided_slice %111 {offsets = [0, 0], sizes = [8, 128], strides = [1, 1]} : vector<8x896xf32> to vector<8x128xf32>
    %113 = vector.extract_strided_slice %111 {offsets = [0, 128], sizes = [8, 128], strides = [1, 1]} : vector<8x896xf32> to vector<8x128xf32>
    %114 = vector.extract_strided_slice %111 {offsets = [0, 256], sizes = [8, 128], strides = [1, 1]} : vector<8x896xf32> to vector<8x128xf32>
    %115 = vector.extract_strided_slice %111 {offsets = [0, 384], sizes = [8, 128], strides = [1, 1]} : vector<8x896xf32> to vector<8x128xf32>
    %116 = vector.extract_strided_slice %111 {offsets = [0, 512], sizes = [8, 128], strides = [1, 1]} : vector<8x896xf32> to vector<8x128xf32>
    %117 = vector.extract_strided_slice %111 {offsets = [0, 640], sizes = [8, 128], strides = [1, 1]} : vector<8x896xf32> to vector<8x128xf32>
    %118 = vector.extract_strided_slice %111 {offsets = [0, 768], sizes = [8, 128], strides = [1, 1]} : vector<8x896xf32> to vector<8x128xf32>
    %119 = arith.mulf %112, %113 : vector<8x128xf32>
    %120 = arith.mulf %114, %115 : vector<8x128xf32>
    %121 = arith.mulf %119, %120 : vector<8x128xf32>
    %122 = arith.mulf %116, %117 : vector<8x128xf32>
    %123 = arith.mulf %122, %118 : vector<8x128xf32>
    %124 = arith.mulf %121, %123 : vector<8x128xf32>
    %c0_56 = arith.constant 0 : index
    %c0_57 = arith.constant 0 : index
    %125 = vector.load %arg8[%c0_56, %c0_57] : memref<128x10xf32, #tpu.memory_space<vmem>>, vector<128x10xf32>
    %cst_58 = arith.constant dense<0.000000e+00> : vector<8x10xf32>
    %126 = tpu.matmul %124, %125, %cst_58 {dimension_numbers = #tpu.dot_dimension_numbers<[1], [0], [0], [1], [0, 0, 1, 1], [], []>} : vector<8x128xf32>, vector<128x10xf32>, vector<8x10xf32> -> vector<8x10xf32>
    %127 = vector.extract_strided_slice %126 {offsets = [0, 0], sizes = [2, 10], strides = [1, 1]} : vector<8x10xf32> to vector<2x10xf32>
    %c0_59 = arith.constant 0 : index
    %c0_60 = arith.constant 0 : index
    %128 = vector.load %arg9[%c0_59, %c0_60] : memref<2x10xf32, #tpu.memory_space<vmem>>, vector<2x10xf32>
    tpu.vector_store %arg9[%c0_59, %c0_60], %127 {strides = array<i32>} : memref<2x10xf32, #tpu.memory_space<vmem>>, vector<2x10xf32>,
    return
  }
  func.func @transform_0(%arg0: i32) -> (i32, i32) {
    %c0_i32 = arith.constant 0 : i32
    %c0_i32_0 = arith.constant 0 : i32
    %c0_i32_1 = arith.constant 0 : i32
    return %c0_i32, %c0_i32_0 : i32, i32
  }
  func.func @transform_1(%arg0: i32) -> (i32, i32) {
    %c0_i32 = arith.constant 0 : i32
    %c0_i32_0 = arith.constant 0 : i32
    %c0_i32_1 = arith.constant 0 : i32
    return %c0_i32, %c0_i32_0 : i32, i32
  }
  func.func @transform_2(%arg0: i32) -> (i32, i32) {
    %c0_i32 = arith.constant 0 : i32
    %c0_i32_0 = arith.constant 0 : i32
    %c0_i32_1 = arith.constant 0 : i32
    return %c0_i32, %c0_i32_0 : i32, i32
  }
  func.func @transform_3(%arg0: i32) -> (i32, i32, i32) {
    %c0_i32 = arith.constant 0 : i32
    %c0_i32_0 = arith.constant 0 : i32
    %c0_i32_1 = arith.constant 0 : i32
    %c0_i32_2 = arith.constant 0 : i32
    return %c0_i32, %c0_i32_0, %c0_i32_1 : i32, i32, i32
  }
  func.func @transform_4(%arg0: i32) -> (i32, i32) {
    %c0_i32 = arith.constant 0 : i32
    %c0_i32_0 = arith.constant 0 : i32
    %c0_i32_1 = arith.constant 0 : i32
    return %c0_i32, %c0_i32_0 : i32, i32
  }
  func.func @transform_5(%arg0: i32) -> (i32, i32) {
    %c0_i32 = arith.constant 0 : i32
    %c0_i32_0 = arith.constant 0 : i32
    %c0_i32_1 = arith.constant 0 : i32
    return %c0_i32, %c0_i32_0 : i32, i32
  }
  func.func @transform_6(%arg0: i32) -> (i32, i32) {
    %c0_i32 = arith.constant 0 : i32
    %c0_i32_0 = arith.constant 0 : i32
    %c0_i32_1 = arith.constant 0 : i32
    return %c0_i32, %c0_i32_0 : i32, i32
  }
  func.func @transform_7(%arg0: i32) -> (i32, i32) {
    %c0_i32 = arith.constant 0 : i32
    %c0_i32_0 = arith.constant 0 : i32
    %c0_i32_1 = arith.constant 0 : i32
    return %c0_i32, %c0_i32_0 : i32, i32
  }
  func.func @transform_8(%arg0: i32) -> (i32, i32) {
    %c0_i32 = arith.constant 0 : i32
    %c0_i32_0 = arith.constant 0 : i32
    %c0_i32_1 = arith.constant 0 : i32
    return %c0_i32, %c0_i32_0 : i32, i32
  }
}

</mosaic_0001>

<bundles_post_ra>
// kernel: neural_decision_forest.1
= control target key start
LH: loop header
LB: loop body
LE: loop exit
PB: predicated region body
PF: predicated region fallthrough
CT: control target
= control target key end

     0   :  { %s2345_s29 = smov 112   ;;  %s2346_s30 = smov 111   ;;  %v2347_v2 = vmov 1.0   ;;  %s3481_s0 = inlined_call_operand.vmem [shape: f32[8,256], index: 0, kind: input, shape index: {}]   ;;  %s3482_s1 = inlined_call_operand.vmem [shape: f32[9,256], index: 1, kind: input, shape index: {}]   ;;  %s3483_s2 = inlined_call_operand.vmem [shape: f32[64,80], index: 2, kind: input, shape index: {}]   ;;  %s3484_s3 = inlined_call_operand.vmem [shape: f32[8,256,32], index: 3, kind: input, shape index: {}]   ;;  %s3485_s4 = inlined_call_operand.vmem [shape: f32[1,32], index: 4, kind: input, shape index: {}]   ;;  %s3486_s5 = inlined_call_operand.vmem [shape: f32[32,896], index: 5, kind: input, shape index: {}]   ;;  %s3487_s6 = inlined_call_operand.vmem [shape: f32[1,896], index: 6, kind: input, shape index: {}]   ;;  %s3488_s7 = inlined_call_operand.vmem [shape: f32[128,10], index: 7, kind: input, shape index: {}]   ;;  %s3489_s8 = inlined_call_operand.hbm [shape: f32[2,10], index: 8, kind: output, shape index: {}]  }
   0x1   :  { %v2405_v0 = vld [vmem:[%s3481_s0] sm:$0xff]  ;;  %v2412_v1 = vld [vmem:[%s3481_s0 + $0x8] sm:$0xff]  ;;  %293 = vmatprep.subr.mxu0 %v2347_v2 }
   0x2   :  { %198 = vrot.lane.b32.xlu1 %v2405_v0, %s2345_s29  ;;  %223 = vrot.lane.b32.xlu0 %v2405_v0, %s2346_s30 }
   0x3   :  { %294 = vmatpush1.msra.mxu0 %v2347_v2 }
   0x6   :  { %200 = vrot.lane.b32.xlu1 %v2412_v1, %s2345_s29  ;;  %225 = vrot.lane.b32.xlu0 %v2412_v1, %s2346_s30 }
   0x7   :  { %13 = vsyncpa [#allocation3], 0  ;;  %s2348_s11 = smov 113   ;;  %s2349_s12 = smov 127   ;;  %v2351_v3 = vmov 0.0   ;;  %v1760_v4 = vld [vmem:[%s3484_s3 + $0x1f8] sm:$0xff]  ;;  %v46_v27 = vlaneseq }
   0x8   :  { %s2350_s0 = smov 1   ;;  %345 = vmatprep.mubr.f32.mxu0 %v2351_v3  ;;  %s2352_s13 = smov 15   ;;  %v1744_v5 = vld [vmem:[%s3484_s3 + $0x178] sm:$0xff]  ;;  %1959 = vmatprep.subr.mxu1 %v1760_v4  ;;  %v1759_v6 = vld [vmem:[%s3484_s3 + $0x1f0] sm:$0xff]  ;;  %v1758_v8 = vld [vmem:[%s3484_s3 + $0x1e8] sm:$0xff]  ;;  %vm202_vm0 = vcmask 916480  }
   0x9   :  { %s2353_s14 = smov 16   ;;  %s2354_s15 = smov 17   ;;  %1960 = vmatpush3.msra.mxu1 %v1744_v5  ;;  %v1743_v7 = vld [vmem:[%s3484_s3 + $0x170] sm:$0xff]  ;;  %v1742_v9 = vld [vmem:[%s3484_s3 + $0x168] sm:$0xff]  ;;  %v1757_v10 = vld [vmem:[%s3484_s3 + $0x1e0] sm:$0xff]  ;;  %v2498_v28 = vshrl.u32 %v46_v27, 7 }
   0xa   :  { %175 = vrot.lane.b32.xlu1 %v2412_v1, %s2348_s11  ;;  %173 = vrot.lane.b32.xlu0 %v2405_v0, %s2348_s11  ;;  %v1741_v11 = vld [vmem:[%s3484_s3 + $0x160] sm:$0xff]  ;;  %v1756_v12 = vld [vmem:[%s3484_s3 + $0x1d8] sm:$0xff]  ;;  %vm227_vm1 = vcmask 908288   ;;  %vm177_vm2 = vcmask 924672   ;;  %vm152_vm3 = vcmask 1039360   ;;  %vm113_vm4 = vcmask 7168  }
   0xb   :  { %1961 = vmatprep.subr.mxu1 %v1759_v6  ;;  %v1740_v13 = vld [vmem:[%s3484_s3 + $0x158] sm:$0xff]  ;;  %v1755_v14 = vld [vmem:[%s3484_s3 + $0x1d0] sm:$0xff]  ;;  %v1754_v16 = vld [vmem:[%s3484_s3 + $0x1c8] sm:$0xff]  ;;  %v2501_v29 = vsub.s32 0, %v2498_v28  ;;  %v2504_v30 = vsub.s32 1, %v2498_v28  ;;  %vm88_vm5 = vcmask 121856  }
   0xc   :  { %1962 = vmatpush3.msra.mxu1 %v1743_v7  ;;  %v1739_v15 = vld [vmem:[%s3484_s3 + $0x150] sm:$0xff]  ;;  %v1738_v17 = vld [vmem:[%s3484_s3 + $0x148] sm:$0xff]  ;;  %v1753_v18 = vld [vmem:[%s3484_s3 + $0x1c0] sm:$0xff]  ;;  %vm63_vm6 = vcmask 130048   ;;  %vm39_vm7 = vcmask 138240   ;;  %vm256_vm8 = vcmask 654336  }
   0xd   :  { %1963 = vmatprep.subr.mxu1 %v1758_v8  ;;  %v1737_v19 = vld [vmem:[%s3484_s3 + $0x140] sm:$0xff]  ;;  %v1752_v20 = vld [vmem:[%s3484_s3 + $0x1b8] sm:$0xff]  ;;  %v1751_v22 = vld [vmem:[%s3484_s3 + $0x1b0] sm:$0xff]  ;;  %vm1318_vm9 = vcmask 261120   ;;  %vm2355_vm10 = vmmov 0   ;;  %vm1697_vm11 = vcmask 74752  }
   0xe   :  { %150 = vrot.lane.b32.xlu1 %v2412_v1, %s2349_s12  ;;  %148 = vrot.lane.b32.xlu0 %v2405_v0, %s2349_s12  ;;  %v1736_v21 = vld [vmem:[%s3484_s3 + $0x138] sm:$0xff]  ;;  %v1735_v23 = vld [vmem:[%s3484_s3 + $0x130] sm:$0xff] }
   0xf   :  { %1964 = vmatpush3.msra.mxu1 %v1742_v9  ;;  %v1750_v24 = vld [vmem:[%s3484_s3 + $0x1a8] sm:$0xff]  ;;  %v1749_v26 = vld [vmem:[%s3484_s3 + $0x1a0] sm:$0xff]  ;;  %v1720_v31 = vld [vmem:[%s3482_s1 + $0x10] ss:$8 sm:$0x3] }
  0x10   :  { %1965 = vmatprep.subr.mxu1 %v1757_v10  ;;  %v1734_v25 = vld [vmem:[%s3484_s3 + $0x128] sm:$0xff]  ;;  %v239_v35 = vrot.slane %v1720_v31, %v2501_v29  ;;  %v243_v36 = vrot.slane %v1720_v31, %v2504_v30 }
  0x11   :  { %1966 = vmatpush3.msra.mxu1 %v1741_v11  ;;  %v1719_v34 = vld [vmem:[%s3482_s1 + $0x7] ss:$8 sm:$0x3]  ;;  %v1718_v37 = vld [vmem:[%s3482_s1 + $0x6] ss:$8 sm:$0x3] }
  0x12   :  { %111 = vrot.lane.b32.xlu1 %v2405_v0, %s2350_s0  ;;  %108 = vrot.lane.b32.xlu0 %v2412_v1, %s2350_s0  ;;  %v214_v38 = vrot.slane %v1719_v34, %v2501_v29  ;;  %v218_v39 = vrot.slane %v1719_v34, %v2504_v30  ;;  %v189_v45 = vrot.slane %v1718_v37, %v2501_v29  ;;  %v1717_v50 = vld [vmem:[%s3482_s1 + $0x5] ss:$8 sm:$0x3]  ;;  %v1716_v51 = vld [vmem:[%s3482_s1 + $0x4] ss:$8 sm:$0x3] }
  0x13   :  { %1967 = vmatprep.subr.mxu1 %v1756_v12  ;;  %v193_v49 = vrot.slane %v1718_v37, %v2504_v30  ;;  %v164_v58 = vrot.slane %v1717_v50, %v2501_v29  ;;  %v168_v61 = vrot.slane %v1717_v50, %v2504_v30  ;;  %v1715_v62 = vld [vmem:[%s3482_s1 + $0x3] ss:$8 sm:$0x3]  ;;  %v143_v63 = vrot.slane %v1716_v51, %v2504_v30  ;;  %v425_v50 = vld [vmem:[%s3484_s3 + $0x78] sm:$0xff] }
  0x14   :  { %1968 = vmatpush3.msra.mxu1 %v1740_v13  ;;  %v139_v2 = vrot.slane %v1716_v51, %v2501_v29  ;;  %v124_v8 = vrot.slane %v1715_v62, %v2501_v29  ;;  %v128_v11 = vrot.slane %v1715_v62, %v2504_v30  ;;  %v440_v51 = vld [vmem:[%s3484_s3 + $0xf0] sm:$0xff] }
  0x15   :  { %1969 = vmatprep.subr.mxu1 %v1755_v14  ;;  %v147_v12 = vmul.f32 %v143_v63, %v2412_v1  ;;  %v1714_v14 = vld [vmem:[%s3482_s1 + $0x2] ss:$8 sm:$0x3]  ;;  %v420_v62 = vld [vmem:[%s3484_s3 + $0x50] sm:$0xff]  ;;  %v251_v63 = vld [vmem:[%s3483_s2 + $0x18] sm:$0xff] }
  0x16   :  { %86 = vrot.lane.b32.xlu1 %v2405_v0, %s2352_s13  ;;  %83 = vrot.lane.b32.xlu0 %v2412_v1, %s2352_s13  ;;  %v146_v13 = vmul.f32 %v139_v2, %v2405_v0  ;;  %v435_v2 = vld [vmem:[%s3484_s3 + $0xc8] sm:$0xff] }
  0x17   :  { %1970 = vmatpush3.msra.mxu1 %v1739_v15 }
  0x18   :  { %1971 = vmatprep.subr.mxu1 %v1754_v16 }
  0x19   :  { %1972 = vmatpush3.msra.mxu1 %v1738_v17 }
  0x1a   :  { %61 = vrot.lane.b32.xlu1 %v2405_v0, %s2353_s14  ;;  %58 = vrot.lane.b32.xlu0 %v2412_v1, %s2353_s14 }
  0x1b   :  { %1973 = vmatprep.subr.mxu1 %v1753_v18 }
  0x1c   :  { %1974 = vmatpush3.msra.mxu1 %v1737_v19 }
  0x1d   :  { %1975 = vmatprep.subr.mxu1 %v1752_v20 }
  0x1e   :  { %37 = vrot.lane.b32.xlu1 %v2405_v0, %s2354_s15  ;;  %33 = vrot.lane.b32.xlu0 %v2412_v1, %s2354_s15  ;;  %v103_v1 = vrot.slane %v1714_v14, %v2504_v30  ;;  %v1713_v0 = vld [vmem:[%s3482_s1 + $0x1] ss:$8 sm:$0x3] }
  0x1f   :  { %1976 = vmatpush3.msra.mxu1 %v1736_v21  ;;  %v99_v21 = vrot.slane %v1714_v14, %v2501_v29  ;;  %v74_v31 = vrot.slane %v1713_v0, %v2501_v29  ;;  %v415_v14 = vld [vmem:[%s3484_s3 + $0x28] sm:$0xff] }
  0x20   :  { %1977 = vmatprep.subr.mxu1 %v1751_v22 }
  0x21   :  { %1978 = vmatpush3.msra.mxu1 %v1735_v23 }
  0x22   :  { %1979 = vmatprep.subr.mxu1 %v1750_v24 }
  0x23   :  { %1980 = vmatpush3.msra.mxu1 %v1734_v25 }
  0x24   :  { %1981 = vmatprep.subr.mxu1 %v1749_v26 }
  0x74   :  { %v199_v32 = vpop.permute.xlu1 %198  ;;  %v224_v33 = vpop.permute.xlu0 %223 }
  0x78   :  { %v201_v40 = vpop.permute.xlu1 %200  ;;  %v226_v41 = vpop.permute.xlu0 %225 }
  0x79   :  { %v207_v42 = vsel %vm202_vm0, %v201_v40, %v199_v32  ;;  %v228_v43 = vsel %vm227_vm1, %v224_v33, %v226_v41  ;;  %v232_v44 = vsel %vm227_vm1, %v226_v41, %v224_v33  ;;  %v203_v46 = vsel %vm202_vm0, %v199_v32, %v201_v40  ;;  %v44_v33 = vld [vmem:[%s3482_s1] ss:$8 sm:$0x3] }
  0x7a   :  { %v246_v47 = vmul.f32 %v239_v35, %v228_v43  ;;  %v247_v48 = vmul.f32 %v243_v36, %v232_v44  ;;  %v222_v52 = vmul.f32 %v218_v39, %v207_v42  ;;  %v221_v55 = vmul.f32 %v214_v38, %v203_v46 }
  0x7b   :  { %v78_v32 = vrot.slane %v1713_v0, %v2504_v30  ;;  %v49_v40 = vrot.slane %v44_v33, %v2501_v29  ;;  %v53_v41 = vrot.slane %v44_v33, %v2504_v30  ;;  %v1748_v0 = vld [vmem:[%s3484_s3 + $0x198] sm:$0xff]  ;;  %v410_v33 = vld [vmem:[%s3484_s3] sm:$0xff] }
  0x7c   :  { %v176_v53 = vpop.permute.xlu1 %175  ;;  %295 = vmatprep.subr.mxu0 %v247_v48  ;;  %v174_v54 = vpop.permute.xlu0 %173  ;;  %v248_v48 = vld [vmem:[%s3483_s2] sm:$0xff] }
  0x7d   :  { %v178_v56 = vsel %vm177_vm2, %v174_v54, %v176_v53  ;;  %v182_v57 = vsel %vm177_vm2, %v176_v53, %v174_v54  ;;  %296 = vmatpush1.msra.mxu0 %v246_v47  ;;  %v249_v53 = vld [vmem:[%s3483_s2 + $0x8] sm:$0xff] }
  0x7e   :  { %v196_v59 = vmul.f32 %v189_v45, %v178_v56  ;;  %v197_v60 = vmul.f32 %v193_v49, %v182_v57  ;;  %297 = vmatprep.subr.mxu0 %v222_v52  ;;  %v441_v49 = vld [vmem:[%s3484_s3 + $0xf8] sm:$0xff]  ;;  %v424_v52 = vld [vmem:[%s3484_s3 + $0x70] sm:$0xff]  ;;  %v439_v54 = vld [vmem:[%s3484_s3 + $0xe8] sm:$0xff] }
  0x7f   :  { %298 = vmatpush1.msra.mxu0 %v221_v55  ;;  %v423_v55 = vld [vmem:[%s3484_s3 + $0x68] sm:$0xff]  ;;  %v438_v56 = vld [vmem:[%s3484_s3 + $0xe0] sm:$0xff] }
  0x80   :  { %v151_v4 = vpop.permute.xlu1 %150  ;;  %299 = vmatprep.subr.mxu0 %v197_v60  ;;  %v149_v5 = vpop.permute.xlu0 %148  ;;  %v422_v57 = vld [vmem:[%s3484_s3 + $0x60] sm:$0xff]  ;;  %v421_v60 = vld [vmem:[%s3484_s3 + $0x58] sm:$0xff] }
  0x81   :  { %v153_v6 = vsel %vm152_vm3, %v149_v5, %v151_v4  ;;  %v157_v7 = vsel %vm152_vm3, %v151_v4, %v149_v5  ;;  %300 = vmatpush1.msra.mxu0 %v196_v59  ;;  %v437_v59 = vld [vmem:[%s3484_s3 + $0xd8] sm:$0xff]  ;;  %v419_v4 = vld [vmem:[%s3484_s3 + $0x48] sm:$0xff]  ;;  %v434_v5 = vld [vmem:[%s3484_s3 + $0xc0] sm:$0xff] }
  0x82   :  { %v171_v9 = vmul.f32 %v164_v58, %v153_v6  ;;  %v172_v10 = vmul.f32 %v168_v61, %v157_v7  ;;  %v250_v58 = vld [vmem:[%s3483_s2 + $0x10] sm:$0xff]  ;;  %v418_v6 = vld [vmem:[%s3484_s3 + $0x40] sm:$0xff] }
  0x83   :  { %v436_v61 = vld [vmem:[%s3484_s3 + $0xd0] sm:$0xff]  ;;  %v252_v7 = vld [vmem:[%s3483_s2 + $0x20] sm:$0xff] }
  0x84   :  { %v112_v15 = vpop.permute.xlu1 %111  ;;  %301 = vmatprep.subr.mxu0 %v172_v10  ;;  %v109_v16 = vpop.permute.xlu0 %108  ;;  %v432_v10 = vld [vmem:[%s3484_s3 + $0xb0] sm:$0xff] }
  0x85   :  { %v114_v17 = vsel %vm113_vm4, %v112_v15, %v109_v16  ;;  %v117_v18 = vsel %vm113_vm4, %v109_v16, %v112_v15  ;;  %302 = vmatpush1.msra.mxu0 %v171_v9  ;;  %v417_v9 = vld [vmem:[%s3484_s3 + $0x38] sm:$0xff]  ;;  %v430_v15 = vld [vmem:[%s3484_s3 + $0xa0] sm:$0xff] }
  0x86   :  { %v131_v19 = vmul.f32 %v124_v8, %v117_v18  ;;  %v132_v20 = vmul.f32 %v128_v11, %v114_v17  ;;  %303 = vmatprep.subr.mxu0 %v147_v12  ;;  %v433_v8 = vld [vmem:[%s3484_s3 + $0xb8] sm:$0xff]  ;;  %v416_v11 = vld [vmem:[%s3484_s3 + $0x30] sm:$0xff]  ;;  %v253_v12 = vld [vmem:[%s3483_s2 + $0x28] sm:$0xff] }
  0x87   :  { %304 = vmatpush1.msra.mxu0 %v146_v13  ;;  %v431_v13 = vld [vmem:[%s3484_s3 + $0xa8] sm:$0xff]  ;;  %v414_v16 = vld [vmem:[%s3484_s3 + $0x20] sm:$0xff]  ;;  %v254_v17 = vld [vmem:[%s3483_s2 + $0x30] sm:$0xff] }
  0x88   :  { %v87_v22 = vpop.permute.xlu1 %86  ;;  %v84_v23 = vpop.permute.xlu0 %83  ;;  %305 = vmatprep.subr.mxu0 %v132_v20  ;;  %v429_v18 = vld [vmem:[%s3484_s3 + $0x98] sm:$0xff] }
  0x89   :  { %v89_v24 = vsel %vm88_vm5, %v87_v22, %v84_v23  ;;  %v92_v25 = vsel %vm88_vm5, %v84_v23, %v87_v22  ;;  %306 = vmatpush1.msra.mxu0 %v131_v19  ;;  %v413_v19 = vld [vmem:[%s3484_s3 + $0x18] sm:$0xff]  ;;  %v412_v22 = vld [vmem:[%s3484_s3 + $0x10] sm:$0xff] }
  0x8a   :  { %v106_v26 = vmul.f32 %v99_v21, %v92_v25  ;;  %v107_v27 = vmul.f32 %v103_v1, %v89_v24  ;;  %v255_v20 = vld [vmem:[%s3483_s2 + $0x38] sm:$0xff]  ;;  %v1733_v21 = vld [vmem:[%s3484_s3 + $0x120] sm:$0xff]  ;;  %v428_v1 = vld [vmem:[%s3484_s3 + $0x90] sm:$0xff] }
  0x8b   :  { %1982 = vmatpush3.msra.mxu1 %v1733_v21  ;;  %v1732_v23 = vld [vmem:[%s3484_s3 + $0x118] sm:$0xff]  ;;  %v427_v24 = vld [vmem:[%s3484_s3 + $0x88] sm:$0xff]  ;;  %v1747_v25 = vld [vmem:[%s3484_s3 + $0x190] sm:$0xff] }
  0x8c   :  { %v62_v34 = vpop.permute.xlu1 %61  ;;  %v59_v35 = vpop.permute.xlu0 %58  ;;  %307 = vmatprep.subr.mxu0 %v107_v27  ;;  %1983 = vmatprep.subr.mxu1 %v1748_v0  ;;  %v1731_v27 = vld [vmem:[%s3484_s3 + $0x110] sm:$0xff]  ;;  %v1784_v21 = vld [vmem:[%s3484_s3 + $0x2b8] sm:$0xff] }
  0x8d   :  { %v64_v36 = vsel %vm63_vm6, %v62_v34, %v59_v35  ;;  %v67_v37 = vsel %vm63_vm6, %v59_v35, %v62_v34  ;;  %308 = vmatpush1.msra.mxu0 %v106_v26  ;;  %1984 = vmatpush3.msra.mxu1 %v1732_v23  ;;  %v411_v26 = vld [vmem:[%s3484_s3 + $0x8] sm:$0xff]  ;;  %v1824_v35 = vld [vmem:[%s3484_s3 + $0x3f8] sm:$0xff] }
  0x8e   :  { %v81_v38 = vmul.f32 %v74_v31, %v67_v37  ;;  %v82_v39 = vmul.f32 %v78_v32, %v64_v36  ;;  %1985 = vmatprep.subr.mxu1 %v1747_v25  ;;  %v426_v31 = vld [vmem:[%s3484_s3 + $0x80] sm:$0xff]  ;;  %v1746_v32 = vld [vmem:[%s3484_s3 + $0x188] sm:$0xff]  ;;  %v1768_v0 = vld [vmem:[%s3484_s3 + $0x238] sm:$0xff] }
  0x8f   :  { %1986 = vmatpush3.msra.mxu1 %v1731_v27  ;;  %v1730_v34 = vld [vmem:[%s3484_s3 + $0x108] sm:$0xff]  ;;  %v1745_v36 = vld [vmem:[%s3484_s3 + $0x180] sm:$0xff] }
  0x90   :  { %v38_v42 = vpop.permute.xlu1 %37  ;;  %v34_v43 = vpop.permute.xlu0 %33  ;;  %309 = vmatprep.subr.mxu0 %v82_v39  ;;  %1987 = vmatprep.subr.mxu1 %v1746_v32  ;;  %v1729_v37 = vld [vmem:[%s3484_s3 + $0x100] sm:$0xff]  ;;  %v1812_v32 = vld [vmem:[%s3484_s3 + $0x398] sm:$0xff] }
  0x91   :  { %v40_v44 = vsel %vm39_vm7, %v38_v42, %v34_v43  ;;  %v43_v45 = vsel %vm39_vm7, %v34_v43, %v38_v42  ;;  %310 = vmatpush1.msra.mxu0 %v81_v38  ;;  %1988 = vmatpush3.msra.mxu1 %v1730_v34  ;;  %v1792_v38 = vld [vmem:[%s3484_s3 + $0x2f8] sm:$0xff]  ;;  %v1813_v25 = vld [vmem:[%s3484_s3 + $0x3a0] sm:$0xff] }
  0x92   :  { %v56_v46 = vmul.f32 %v49_v40, %v43_v45  ;;  %v57_v47 = vmul.f32 %v53_v41, %v40_v44  ;;  %1989 = vmatprep.subr.mxu1 %v1745_v36  ;;  %v1808_v44 = vld [vmem:[%s3484_s3 + $0x378] sm:$0xff]  ;;  %v1823_v45 = vld [vmem:[%s3484_s3 + $0x3f0] sm:$0xff]  ;;  %v1797_v27 = vld [vmem:[%s3484_s3 + $0x320] sm:$0xff] }
  0x93   :  { %1990 = vmatpush3.msra.mxu1 %v1729_v37  ;;  %v1796_v34 = vld [vmem:[%s3484_s3 + $0x318] sm:$0xff]  ;;  %v1781_v36 = vld [vmem:[%s3484_s3 + $0x2a0] sm:$0xff]  ;;  %v1811_v37 = vld [vmem:[%s3484_s3 + $0x390] sm:$0xff] }
  0x94   :  { %311 = vmatprep.subr.mxu0 %v57_v47  ;;  %2029 = vmatprep.subr.mxu1 %v1792_v38  ;;  %v1807_v47 = vld [vmem:[%s3484_s3 + $0x370] sm:$0xff]  ;;  %v1765_v38 = vld [vmem:[%s3484_s3 + $0x220] sm:$0xff] }
  0x95   :  { %312 = vmatpush1.msra.mxu0 %v56_v46 }
  0x96   :  { %1721 = vmatmul.mubr.msk.f32.vlgmr.msra.gmra.mxu0 %vm256_vm8, %v248_v48  ;;  %1994 = vmatprep.subr.mxu0 %v441_v49  ;;  %v1822_v49 = vld [vmem:[%s3484_s3 + $0x3e8] sm:$0xff] }
  0x97   :  { %351 = vmatprep.mubr.f32.mxu0 %v2351_v3  ;;  %1995 = vmatpush3.msra.mxu0 %v425_v50 }
  0x98   :  { %1996 = vmatprep.subr.mxu0 %v440_v51  ;;  %v1776_v51 = vld [vmem:[%s3484_s3 + $0x278] sm:$0xff] }
  0x99   :  { %1997 = vmatpush3.msra.mxu0 %v424_v52  ;;  %v1806_v52 = vld [vmem:[%s3484_s3 + $0x368] sm:$0xff] }
  0x9a   :  { %1722 = vmatmul.mubr.msk.f32.gmra.mxu0 %vm256_vm8, %v249_v53  ;;  %1998 = vmatprep.subr.mxu0 %v439_v54  ;;  %v1791_v53 = vld [vmem:[%s3484_s3 + $0x2f0] sm:$0xff]  ;;  %v1821_v54 = vld [vmem:[%s3484_s3 + $0x3e0] sm:$0xff] }
  0x9b   :  { %357 = vmatprep.mubr.f32.mxu0 %v2351_v3  ;;  %1999 = vmatpush3.msra.mxu0 %v423_v55  ;;  %v1775_v55 = vld [vmem:[%s3484_s3 + $0x270] sm:$0xff] }
  0x9c   :  { %2000 = vmatprep.subr.mxu0 %v438_v56  ;;  %v1805_v56 = vld [vmem:[%s3484_s3 + $0x360] sm:$0xff] }
  0x9d   :  { %2001 = vmatpush3.msra.mxu0 %v422_v57  ;;  %v1790_v57 = vld [vmem:[%s3484_s3 + $0x2e8] sm:$0xff] }
  0x9e   :  { %1723 = vmatmul.mubr.msk.f32.gmra.mxu0 %vm256_vm8, %v250_v58  ;;  %2002 = vmatprep.subr.mxu0 %v437_v59  ;;  %v1820_v58 = vld [vmem:[%s3484_s3 + $0x3d8] sm:$0xff]  ;;  %v1774_v59 = vld [vmem:[%s3484_s3 + $0x268] sm:$0xff] }
  0x9f   :  { %363 = vmatprep.mubr.f32.mxu0 %v2351_v3  ;;  %2003 = vmatpush3.msra.mxu0 %v421_v60  ;;  %v1804_v60 = vld [vmem:[%s3484_s3 + $0x358] sm:$0xff] }
  0xa0   :  { %2004 = vmatprep.subr.mxu0 %v436_v61  ;;  %v1789_v61 = vld [vmem:[%s3484_s3 + $0x2e0] sm:$0xff] }
  0xa1   :  { %2005 = vmatpush3.msra.mxu0 %v420_v62  ;;  %v1819_v62 = vld [vmem:[%s3484_s3 + $0x3d0] sm:$0xff] }
  0xa2   :  { %1724 = vmatmul.mubr.msk.f32.gmra.mxu0 %vm256_vm8, %v251_v63  ;;  %2006 = vmatprep.subr.mxu0 %v435_v2  ;;  %v1773_v63 = vld [vmem:[%s3484_s3 + $0x260] sm:$0xff]  ;;  %v1803_v2 = vld [vmem:[%s3484_s3 + $0x350] sm:$0xff] }
  0xa3   :  { %369 = vmatprep.mubr.f32.mxu0 %v2351_v3  ;;  %2007 = vmatpush3.msra.mxu0 %v419_v4  ;;  %v1788_v4 = vld [vmem:[%s3484_s3 + $0x2d8] sm:$0xff] }
  0xa4   :  { %2008 = vmatprep.subr.mxu0 %v434_v5  ;;  %v1818_v5 = vld [vmem:[%s3484_s3 + $0x3c8] sm:$0xff] }
  0xa5   :  { %2009 = vmatpush3.msra.mxu0 %v418_v6  ;;  %v1772_v6 = vld [vmem:[%s3484_s3 + $0x258] sm:$0xff] }
  0xa6   :  { %1725 = vmatmul.mubr.msk.f32.gmra.mxu0 %vm256_vm8, %v252_v7  ;;  %2010 = vmatprep.subr.mxu0 %v433_v8  ;;  %v1802_v7 = vld [vmem:[%s3484_s3 + $0x348] sm:$0xff]  ;;  %v1787_v8 = vld [vmem:[%s3484_s3 + $0x2d0] sm:$0xff] }
  0xa7   :  { %375 = vmatprep.mubr.f32.mxu0 %v2351_v3  ;;  %2011 = vmatpush3.msra.mxu0 %v417_v9  ;;  %v1817_v9 = vld [vmem:[%s3484_s3 + $0x3c0] sm:$0xff] }
  0xa8   :  { %2012 = vmatprep.subr.mxu0 %v432_v10  ;;  %v1771_v10 = vld [vmem:[%s3484_s3 + $0x250] sm:$0xff] }
  0xa9   :  { %2013 = vmatpush3.msra.mxu0 %v416_v11  ;;  %v1801_v11 = vld [vmem:[%s3484_s3 + $0x340] sm:$0xff] }
  0xaa   :  { %1726 = vmatmul.mubr.msk.f32.gmra.mxu0 %vm256_vm8, %v253_v12  ;;  %2014 = vmatprep.subr.mxu0 %v431_v13  ;;  %v1786_v12 = vld [vmem:[%s3484_s3 + $0x2c8] sm:$0xff]  ;;  %v1816_v13 = vld [vmem:[%s3484_s3 + $0x3b8] sm:$0xff] }
  0xab   :  { %381 = vmatprep.mubr.f32.mxu0 %v2351_v3  ;;  %2015 = vmatpush3.msra.mxu0 %v415_v14  ;;  %v1770_v14 = vld [vmem:[%s3484_s3 + $0x248] sm:$0xff] }
  0xac   :  { %2016 = vmatprep.subr.mxu0 %v430_v15  ;;  %v1800_v15 = vld [vmem:[%s3484_s3 + $0x338] sm:$0xff] }
  0xad   :  { %2017 = vmatpush3.msra.mxu0 %v414_v16 }
  0xae   :  { %1727 = vmatmul.mubr.msk.f32.gmra.mxu0 %vm256_vm8, %v254_v17  ;;  %2018 = vmatprep.subr.mxu0 %v429_v18  ;;  %v1785_v17 = vld [vmem:[%s3484_s3 + $0x2c0] sm:$0xff]  ;;  %v1815_v18 = vld [vmem:[%s3484_s3 + $0x3b0] sm:$0xff] }
  0xaf   :  { %387 = vmatprep.mubr.f32.mxu0 %v2351_v3  ;;  %2019 = vmatpush3.msra.mxu0 %v413_v19  ;;  %v1769_v19 = vld [vmem:[%s3484_s3 + $0x240] sm:$0xff] }
  0xb0   :  { %2020 = vmatprep.subr.mxu0 %v428_v1  ;;  %v1814_v1 = vld [vmem:[%s3484_s3 + $0x3a8] sm:$0xff] }
  0xb1   :  { %2021 = vmatpush3.msra.mxu0 %v412_v22  ;;  %v1798_v22 = vld [vmem:[%s3484_s3 + $0x328] sm:$0xff] }
  0xb2   :  { %1728 = vmatmul.mubr.msk.f32.gmra.mxu0 %vm256_vm8, %v255_v20  ;;  %2022 = vmatprep.subr.mxu0 %v427_v24  ;;  %v1799_v20 = vld [vmem:[%s3484_s3 + $0x330] sm:$0xff] }
  0xb3   :  { %2023 = vmatpush3.msra.mxu0 %v411_v26  ;;  %v1783_v24 = vld [vmem:[%s3484_s3 + $0x2b0] sm:$0xff] }
  0xb4   :  { %2024 = vmatprep.subr.mxu0 %v426_v31  ;;  %v1767_v26 = vld [vmem:[%s3484_s3 + $0x230] sm:$0xff]  ;;  %v1782_v31 = vld [vmem:[%s3484_s3 + $0x2a8] sm:$0xff] }
  0xb5   :  { %2025 = vmatpush3.msra.mxu0 %v410_v33  ;;  %v1766_v33 = vld [vmem:[%s3484_s3 + $0x228] sm:$0xff] }
  0xb6   :  { %2064 = vmatprep.subr.mxu0 %v1824_v35 }
 0x156   :  { %v347_v39 = vpop.f32.mrf.mxu0 }
 0x157   :  { %v394_v42 = vmax.f32 %v347_v39, 0.0  ;;  %v1795_v39 = vld [vmem:[%s3484_s3 + $0x310] sm:$0xff] }
 0x158   :  { %v349_v40 = vpop.f32.mrf.mxu0 }
 0x159   :  { %v395_v41 = vmax.f32 %v349_v40, 0.0  ;;  %v1780_v40 = vld [vmem:[%s3484_s3 + $0x298] sm:$0xff] }
 0x15a   :  { %v353_v43 = vpop.f32.mrf.mxu0 }
 0x15b   :  { %609 = vmatprep.mubr.f32.mxu0 %v395_v41  ;;  %v396_v50 = vmax.f32 %v353_v43, 0.0  ;;  %v1810_v41 = vld [vmem:[%s3484_s3 + $0x388] sm:$0xff] }
 0x15c   :  { %v355_v46 = vpop.f32.mrf.mxu0  ;;  %610 = vmatmul.mubr.f32.vlgmr.msra.gmra.mxu0 %v394_v42  ;;  %v1764_v42 = vld [vmem:[%s3484_s3 + $0x218] sm:$0xff] }
 0x15d   :  { %2065 = vmatpush3.msra.mxu0 %v1808_v44  ;;  %v397_v48 = vmax.f32 %v355_v46, 0.0  ;;  %v1794_v44 = vld [vmem:[%s3484_s3 + $0x308] sm:$0xff]  ;;  %v1779_v46 = vld [vmem:[%s3484_s3 + $0x290] sm:$0xff] }
 0x15e   :  { %2066 = vmatprep.subr.mxu0 %v1823_v45  ;;  %v2815_v16 = vpop.f32.mrf.mxu0 }
 0x15f   :  { %539 = vmatprep.mubr.f32.mxu1 %v397_v48  ;;  %2067 = vmatpush3.msra.mxu0 %v1807_v47  ;;  %v1809_v47 = vld [vmem:[%s3484_s3 + $0x380] sm:$0xff]  ;;  %v1763_v48 = vld [vmem:[%s3484_s3 + $0x210] sm:$0xff] }
 0x160   :  { %540 = vmatmul.mubr.f32.vlgmr.msra.gmra.mxu1 %v396_v50  ;;  %2068 = vmatprep.subr.mxu0 %v1822_v49  ;;  %v361_v23 = vpop.f32.mrf.mxu0  ;;  %v1778_v50 = vld [vmem:[%s3484_s3 + $0x288] sm:$0xff] }
 0x161   :  { %2030 = vmatpush3.msra.mxu1 %v1776_v51  ;;  %2069 = vmatpush3.msra.mxu0 %v1806_v52  ;;  %v399_v45 = vmax.f32 %v361_v23, 0.0  ;;  %v1793_v51 = vld [vmem:[%s3484_s3 + $0x300] sm:$0xff]  ;;  %v1762_v52 = vld [vmem:[%s3484_s3 + $0x208] sm:$0xff] }
 0x162   :  { %2031 = vmatprep.subr.mxu1 %v1791_v53  ;;  %2070 = vmatprep.subr.mxu0 %v1821_v54  ;;  %v365_v35 = vpop.f32.mrf.mxu0  ;;  %v1888_v54 = vld [vmem:[%s3484_s3 + $0x5f8] sm:$0xff]  ;;  %v1834_v23 = vld [vmem:[%s3484_s3 + $0x448] sm:$0xff] }
 0x163   :  { %2032 = vmatpush3.msra.mxu1 %v1775_v55  ;;  %2071 = vmatpush3.msra.mxu0 %v1805_v56  ;;  %v400_v53 = vmax.f32 %v365_v35, 0.0  ;;  %v1777_v55 = vld [vmem:[%s3484_s3 + $0x280] sm:$0xff]  ;;  %v1832_v35 = vld [vmem:[%s3484_s3 + $0x438] sm:$0xff] }
 0x164   :  { %2033 = vmatprep.subr.mxu1 %v1790_v57  ;;  %2072 = vmatprep.subr.mxu0 %v1820_v58  ;;  %v367_v43 = vpop.f32.mrf.mxu0  ;;  %v1761_v56 = vld [vmem:[%s3484_s3 + $0x200] sm:$0xff]  ;;  %v1872_v57 = vld [vmem:[%s3484_s3 + $0x578] sm:$0xff]  ;;  %v398_v58 = vmax.f32 %v2815_v16, 0.0  ;;  %v1867_v16 = vld [vmem:[%s3484_s3 + $0x550] sm:$0xff] }
 0x165   :  { %2034 = vmatpush3.msra.mxu1 %v1774_v59  ;;  %2073 = vmatpush3.msra.mxu0 %v1804_v60  ;;  %v401_v49 = vmax.f32 %v367_v43, 0.0  ;;  %v1887_v59 = vld [vmem:[%s3484_s3 + $0x5f0] sm:$0xff]  ;;  %v1856_v60 = vld [vmem:[%s3484_s3 + $0x4f8] sm:$0xff]  ;;  %v1861_v43 = vld [vmem:[%s3484_s3 + $0x520] sm:$0xff] }
 0x166   :  { %2035 = vmatprep.subr.mxu1 %v1789_v61  ;;  %2074 = vmatprep.subr.mxu0 %v1819_v62  ;;  %v1871_v61 = vld [vmem:[%s3484_s3 + $0x570] sm:$0xff]  ;;  %v1840_v62 = vld [vmem:[%s3484_s3 + $0x478] sm:$0xff] }
 0x167   :  { %2036 = vmatpush3.msra.mxu1 %v1773_v63  ;;  %2075 = vmatpush3.msra.mxu0 %v1803_v2  ;;  %v1886_v63 = vld [vmem:[%s3484_s3 + $0x5e8] sm:$0xff]  ;;  %v1855_v2 = vld [vmem:[%s3484_s3 + $0x4f0] sm:$0xff] }
 0x168   :  { %2037 = vmatprep.subr.mxu1 %v1788_v4  ;;  %2076 = vmatprep.subr.mxu0 %v1818_v5  ;;  %v1870_v4 = vld [vmem:[%s3484_s3 + $0x568] sm:$0xff]  ;;  %v1839_v5 = vld [vmem:[%s3484_s3 + $0x470] sm:$0xff] }
 0x169   :  { %2038 = vmatpush3.msra.mxu1 %v1772_v6  ;;  %2077 = vmatpush3.msra.mxu0 %v1802_v7  ;;  %v1885_v6 = vld [vmem:[%s3484_s3 + $0x5e0] sm:$0xff]  ;;  %v1854_v7 = vld [vmem:[%s3484_s3 + $0x4e8] sm:$0xff] }
 0x16a   :  { %2039 = vmatprep.subr.mxu1 %v1787_v8  ;;  %2078 = vmatprep.subr.mxu0 %v1817_v9  ;;  %v1869_v8 = vld [vmem:[%s3484_s3 + $0x560] sm:$0xff]  ;;  %v1838_v9 = vld [vmem:[%s3484_s3 + $0x468] sm:$0xff] }
 0x16b   :  { %2040 = vmatpush3.msra.mxu1 %v1771_v10  ;;  %2079 = vmatpush3.msra.mxu0 %v1801_v11  ;;  %v1884_v10 = vld [vmem:[%s3484_s3 + $0x5d8] sm:$0xff]  ;;  %v1853_v11 = vld [vmem:[%s3484_s3 + $0x4e0] sm:$0xff] }
 0x16c   :  { %2041 = vmatprep.subr.mxu1 %v1786_v12  ;;  %2080 = vmatprep.subr.mxu0 %v1816_v13  ;;  %v1868_v12 = vld [vmem:[%s3484_s3 + $0x558] sm:$0xff]  ;;  %v1837_v13 = vld [vmem:[%s3484_s3 + $0x460] sm:$0xff] }
 0x16d   :  { %2042 = vmatpush3.msra.mxu1 %v1770_v14  ;;  %2081 = vmatpush3.msra.mxu0 %v1800_v15  ;;  %v1883_v14 = vld [vmem:[%s3484_s3 + $0x5d0] sm:$0xff]  ;;  %v1852_v15 = vld [vmem:[%s3484_s3 + $0x4d8] sm:$0xff] }
 0x16e   :  { %2043 = vmatprep.subr.mxu1 %v1785_v17  ;;  %2082 = vmatprep.subr.mxu0 %v1815_v18  ;;  %v1836_v17 = vld [vmem:[%s3484_s3 + $0x458] sm:$0xff]  ;;  %v1882_v18 = vld [vmem:[%s3484_s3 + $0x5c8] sm:$0xff] }
 0x16f   :  { %2044 = vmatpush3.msra.mxu1 %v1769_v19  ;;  %2083 = vmatpush3.msra.mxu0 %v1799_v20  ;;  %v1851_v19 = vld [vmem:[%s3484_s3 + $0x4d0] sm:$0xff]  ;;  %v1866_v20 = vld [vmem:[%s3484_s3 + $0x548] sm:$0xff] }
 0x170   :  { %2045 = vmatprep.subr.mxu1 %v1784_v21  ;;  %2084 = vmatprep.subr.mxu0 %v1814_v1  ;;  %v1835_v21 = vld [vmem:[%s3484_s3 + $0x450] sm:$0xff]  ;;  %v1881_v1 = vld [vmem:[%s3484_s3 + $0x5c0] sm:$0xff] }
 0x171   :  { %2046 = vmatpush3.msra.mxu1 %v1768_v0  ;;  %2085 = vmatpush3.msra.mxu0 %v1798_v22  ;;  %v1850_v0 = vld [vmem:[%s3484_s3 + $0x4c8] sm:$0xff]  ;;  %v1865_v22 = vld [vmem:[%s3484_s3 + $0x540] sm:$0xff] }
 0x172   :  { %2047 = vmatprep.subr.mxu1 %v1783_v24  ;;  %2086 = vmatprep.subr.mxu0 %v1813_v25  ;;  %v1880_v24 = vld [vmem:[%s3484_s3 + $0x5b8] sm:$0xff]  ;;  %v1849_v25 = vld [vmem:[%s3484_s3 + $0x4c0] sm:$0xff] }
 0x173   :  { %2048 = vmatpush3.msra.mxu1 %v1767_v26  ;;  %2087 = vmatpush3.msra.mxu0 %v1797_v27  ;;  %v3010_v26 = vpop.f32.mrf.mxu0  ;;  %v1864_v27 = vld [vmem:[%s3484_s3 + $0x538] sm:$0xff] }
 0x174   :  { %2049 = vmatprep.subr.mxu1 %v1782_v31  ;;  %2088 = vmatprep.subr.mxu0 %v1812_v32  ;;  %v1833_v31 = vld [vmem:[%s3484_s3 + $0x440] sm:$0xff]  ;;  %v1879_v32 = vld [vmem:[%s3484_s3 + $0x5b0] sm:$0xff] }
 0x175   :  { %2050 = vmatpush3.msra.mxu1 %v1766_v33  ;;  %2089 = vmatpush3.msra.mxu0 %v1796_v34  ;;  %v1848_v33 = vld [vmem:[%s3484_s3 + $0x4b8] sm:$0xff]  ;;  %v1863_v34 = vld [vmem:[%s3484_s3 + $0x530] sm:$0xff] }
 0x176   :  { %2051 = vmatprep.subr.mxu1 %v1781_v36  ;;  %2090 = vmatprep.subr.mxu0 %v1811_v37  ;;  %v1878_v36 = vld [vmem:[%s3484_s3 + $0x5a8] sm:$0xff]  ;;  %v1847_v37 = vld [vmem:[%s3484_s3 + $0x4b0] sm:$0xff] }
 0x177   :  { %2052 = vmatpush3.msra.mxu1 %v1765_v38  ;;  %2091 = vmatpush3.msra.mxu0 %v1795_v39  ;;  %v373_v38 = vpop.f32.mrf.mxu0  ;;  %v1862_v39 = vld [vmem:[%s3484_s3 + $0x528] sm:$0xff] }
 0x178   :  { %2053 = vmatprep.subr.mxu1 %v1780_v40  ;;  %2092 = vmatprep.subr.mxu0 %v1810_v41  ;;  %v1831_v40 = vld [vmem:[%s3484_s3 + $0x430] sm:$0xff]  ;;  %v1877_v41 = vld [vmem:[%s3484_s3 + $0x5a0] sm:$0xff] }
 0x179   :  { %2054 = vmatpush3.msra.mxu1 %v1764_v42  ;;  %2093 = vmatpush3.msra.mxu0 %v1794_v44  ;;  %v1846_v42 = vld [vmem:[%s3484_s3 + $0x4a8] sm:$0xff] }
 0x17a   :  { %2055 = vmatprep.subr.mxu1 %v1779_v46  ;;  %2094 = vmatprep.subr.mxu0 %v1809_v47  ;;  %v1830_v44 = vld [vmem:[%s3484_s3 + $0x428] sm:$0xff]  ;;  %v1845_v46 = vld [vmem:[%s3484_s3 + $0x4a0] sm:$0xff]  ;;  %v377_v47 = vpop.f32.mrf.mxu0 }
 0x17b   :  { %2056 = vmatpush3.msra.mxu1 %v1763_v48  ;;  %712 = vmatprep.mubr.f32.mxu1 %v399_v45  ;;  %v1876_v45 = vld [vmem:[%s3484_s3 + $0x598] sm:$0xff] }
 0x17c   :  { %2057 = vmatprep.subr.mxu1 %v1778_v50  ;;  %2095 = vmatpush3.msra.mxu0 %v1793_v51  ;;  %v1860_v48 = vld [vmem:[%s3484_s3 + $0x518] sm:$0xff]  ;;  %v1875_v50 = vld [vmem:[%s3484_s3 + $0x590] sm:$0xff] }
 0x17d   :  { %2058 = vmatpush3.msra.mxu1 %v1762_v52  ;;  %816 = vmatprep.mubr.f32.mxu0 %v401_v49  ;;  %v1829_v49 = vld [vmem:[%s3484_s3 + $0x420] sm:$0xff]  ;;  %v1844_v51 = vld [vmem:[%s3484_s3 + $0x498] sm:$0xff]  ;;  %v1859_v52 = vld [vmem:[%s3484_s3 + $0x510] sm:$0xff] }
 0x17e   :  { %2134 = vmatprep.subr.mxu0 %v1888_v54  ;;  %2059 = vmatprep.subr.mxu1 %v1777_v55  ;;  %v1874_v54 = vld [vmem:[%s3484_s3 + $0x588] sm:$0xff]  ;;  %v379_v55 = vpop.f32.mrf.mxu0 }
 0x17f   :  { %817 = vmatmul.mubr.f32.vlgmr.msra.gmra.mxu0 %v400_v53  ;;  %2060 = vmatpush3.msra.mxu1 %v1761_v56  ;;  %v1828_v53 = vld [vmem:[%s3484_s3 + $0x418] sm:$0xff]  ;;  %v1843_v56 = vld [vmem:[%s3484_s3 + $0x490] sm:$0xff] }
 0x180   :  { %2135 = vmatpush3.msra.mxu0 %v1872_v57  ;;  %713 = vmatmul.mubr.f32.vlgmr.msra.gmra.mxu1 %v398_v58  ;;  %v1858_v57 = vld [vmem:[%s3484_s3 + $0x508] sm:$0xff]  ;;  %v1827_v58 = vld [vmem:[%s3484_s3 + $0x410] sm:$0xff] }
 0x181   :  { %2136 = vmatprep.subr.mxu0 %v1887_v59  ;;  %2099 = vmatprep.subr.mxu1 %v1856_v60  ;;  %v403_v59 = vmax.f32 %v373_v38, 0.0  ;;  %v1873_v60 = vld [vmem:[%s3484_s3 + $0x580] sm:$0xff]  ;;  %v1898_v38 = vld [vmem:[%s3484_s3 + $0x648] sm:$0xff] }
 0x182   :  { %2137 = vmatpush3.msra.mxu0 %v1871_v61  ;;  %2100 = vmatpush3.msra.mxu1 %v1840_v62  ;;  %v1842_v61 = vld [vmem:[%s3484_s3 + $0x488] sm:$0xff]  ;;  %v405_v62 = vmax.f32 %v379_v55, 0.0  ;;  %v1925_v55 = vld [vmem:[%s3484_s3 + $0x720] sm:$0xff] }
 0x183   :  { %2138 = vmatprep.subr.mxu0 %v1886_v63  ;;  %2101 = vmatprep.subr.mxu1 %v1855_v2  ;;  %v1857_v63 = vld [vmem:[%s3484_s3 + $0x500] sm:$0xff]  ;;  %v1826_v2 = vld [vmem:[%s3484_s3 + $0x408] sm:$0xff] }
 0x184   :  { %2139 = vmatpush3.msra.mxu0 %v1870_v4  ;;  %2102 = vmatpush3.msra.mxu1 %v1839_v5  ;;  %v404_v4 = vmax.f32 %v377_v47, 0.0  ;;  %v1952_v5 = vld [vmem:[%s3484_s3 + $0x7f8] sm:$0xff] }
 0x185   :  { %2140 = vmatprep.subr.mxu0 %v1885_v6  ;;  %2103 = vmatprep.subr.mxu1 %v1854_v7  ;;  %v1841_v6 = vld [vmem:[%s3484_s3 + $0x480] sm:$0xff]  ;;  %v1896_v47 = vld [vmem:[%s3484_s3 + $0x638] sm:$0xff] }
 0x186   :  { %2141 = vmatpush3.msra.mxu0 %v1869_v8  ;;  %2104 = vmatpush3.msra.mxu1 %v1838_v9  ;;  %v1825_v7 = vld [vmem:[%s3484_s3 + $0x400] sm:$0xff]  ;;  %v1936_v8 = vld [vmem:[%s3484_s3 + $0x778] sm:$0xff]  ;;  %v402_v9 = vmax.f32 %v3010_v26, 0.0  ;;  %v1931_v26 = vld [vmem:[%s3484_s3 + $0x750] sm:$0xff] }
 0x187   :  { %2142 = vmatprep.subr.mxu0 %v1884_v10  ;;  %2105 = vmatprep.subr.mxu1 %v1853_v11  ;;  %v1951_v10 = vld [vmem:[%s3484_s3 + $0x7f0] sm:$0xff]  ;;  %v1920_v11 = vld [vmem:[%s3484_s3 + $0x6f8] sm:$0xff] }
 0x188   :  { %2143 = vmatpush3.msra.mxu0 %v1868_v12  ;;  %2106 = vmatpush3.msra.mxu1 %v1837_v13  ;;  %v1935_v12 = vld [vmem:[%s3484_s3 + $0x770] sm:$0xff]  ;;  %v1904_v13 = vld [vmem:[%s3484_s3 + $0x678] sm:$0xff] }
 0x189   :  { %2144 = vmatprep.subr.mxu0 %v1883_v14  ;;  %2107 = vmatprep.subr.mxu1 %v1852_v15  ;;  %v1950_v14 = vld [vmem:[%s3484_s3 + $0x7e8] sm:$0xff]  ;;  %v1919_v15 = vld [vmem:[%s3484_s3 + $0x6f0] sm:$0xff] }
 0x18a   :  { %2145 = vmatpush3.msra.mxu0 %v1867_v16  ;;  %2108 = vmatpush3.msra.mxu1 %v1836_v17  ;;  %v1934_v16 = vld [vmem:[%s3484_s3 + $0x768] sm:$0xff]  ;;  %v1903_v17 = vld [vmem:[%s3484_s3 + $0x670] sm:$0xff] }
 0x18b   :  { %2146 = vmatprep.subr.mxu0 %v1882_v18  ;;  %2109 = vmatprep.subr.mxu1 %v1851_v19  ;;  %v1949_v18 = vld [vmem:[%s3484_s3 + $0x7e0] sm:$0xff]  ;;  %v1918_v19 = vld [vmem:[%s3484_s3 + $0x6e8] sm:$0xff] }
 0x18c   :  { %2147 = vmatpush3.msra.mxu0 %v1866_v20  ;;  %2110 = vmatpush3.msra.mxu1 %v1835_v21  ;;  %v1933_v20 = vld [vmem:[%s3484_s3 + $0x760] sm:$0xff]  ;;  %v1902_v21 = vld [vmem:[%s3484_s3 + $0x668] sm:$0xff] }
 0x18d   :  { %2148 = vmatprep.subr.mxu0 %v1881_v1  ;;  %2111 = vmatprep.subr.mxu1 %v1850_v0  ;;  %v1948_v1 = vld [vmem:[%s3484_s3 + $0x7d8] sm:$0xff]  ;;  %v1917_v0 = vld [vmem:[%s3484_s3 + $0x6e0] sm:$0xff] }
 0x18e   :  { %2149 = vmatpush3.msra.mxu0 %v1865_v22  ;;  %2112 = vmatpush3.msra.mxu1 %v1834_v23  ;;  %v1932_v22 = vld [vmem:[%s3484_s3 + $0x758] sm:$0xff]  ;;  %v1901_v23 = vld [vmem:[%s3484_s3 + $0x660] sm:$0xff] }
 0x18f   :  { %2150 = vmatprep.subr.mxu0 %v1880_v24  ;;  %2113 = vmatprep.subr.mxu1 %v1849_v25  ;;  %v1947_v24 = vld [vmem:[%s3484_s3 + $0x7d0] sm:$0xff]  ;;  %v1916_v25 = vld [vmem:[%s3484_s3 + $0x6d8] sm:$0xff] }
 0x190   :  { %2151 = vmatpush3.msra.mxu0 %v1864_v27  ;;  %2114 = vmatpush3.msra.mxu1 %v1833_v31  ;;  %v1900_v27 = vld [vmem:[%s3484_s3 + $0x658] sm:$0xff]  ;;  %v1946_v31 = vld [vmem:[%s3484_s3 + $0x7c8] sm:$0xff] }
 0x191   :  { %2152 = vmatprep.subr.mxu0 %v1879_v32  ;;  %2115 = vmatprep.subr.mxu1 %v1848_v33  ;;  %v1915_v32 = vld [vmem:[%s3484_s3 + $0x6d0] sm:$0xff]  ;;  %v1930_v33 = vld [vmem:[%s3484_s3 + $0x748] sm:$0xff] }
 0x192   :  { %2153 = vmatpush3.msra.mxu0 %v1863_v34  ;;  %2116 = vmatpush3.msra.mxu1 %v1832_v35  ;;  %v1899_v34 = vld [vmem:[%s3484_s3 + $0x650] sm:$0xff]  ;;  %v1945_v35 = vld [vmem:[%s3484_s3 + $0x7c0] sm:$0xff] }
 0x193   :  { %2154 = vmatprep.subr.mxu0 %v1878_v36  ;;  %2117 = vmatprep.subr.mxu1 %v1847_v37  ;;  %v1914_v36 = vld [vmem:[%s3484_s3 + $0x6c8] sm:$0xff]  ;;  %v1929_v37 = vld [vmem:[%s3484_s3 + $0x740] sm:$0xff] }
 0x194   :  { %2155 = vmatpush3.msra.mxu0 %v1862_v39  ;;  %2118 = vmatpush3.msra.mxu1 %v1831_v40  ;;  %v1944_v39 = vld [vmem:[%s3484_s3 + $0x7b8] sm:$0xff]  ;;  %v1913_v40 = vld [vmem:[%s3484_s3 + $0x6c0] sm:$0xff] }
 0x195   :  { %2156 = vmatprep.subr.mxu0 %v1877_v41  ;;  %2119 = vmatprep.subr.mxu1 %v1846_v42  ;;  %v3205_v41 = vpop.f32.mrf.mxu0  ;;  %v1928_v42 = vld [vmem:[%s3484_s3 + $0x738] sm:$0xff] }
 0x196   :  { %2157 = vmatpush3.msra.mxu0 %v1861_v43  ;;  %2120 = vmatpush3.msra.mxu1 %v1830_v44  ;;  %v1897_v43 = vld [vmem:[%s3484_s3 + $0x640] sm:$0xff]  ;;  %v1943_v44 = vld [vmem:[%s3484_s3 + $0x7b0] sm:$0xff] }
 0x197   :  { %2158 = vmatprep.subr.mxu0 %v1876_v45  ;;  %2121 = vmatprep.subr.mxu1 %v1845_v46  ;;  %v1912_v45 = vld [vmem:[%s3484_s3 + $0x6b8] sm:$0xff]  ;;  %v1927_v46 = vld [vmem:[%s3484_s3 + $0x730] sm:$0xff] }
 0x198   :  { %2159 = vmatpush3.msra.mxu0 %v1860_v48  ;;  %2122 = vmatpush3.msra.mxu1 %v1829_v49  ;;  %v1942_v48 = vld [vmem:[%s3484_s3 + $0x7a8] sm:$0xff]  ;;  %v1911_v49 = vld [vmem:[%s3484_s3 + $0x6b0] sm:$0xff] }
 0x199   :  { %2160 = vmatprep.subr.mxu0 %v1875_v50  ;;  %2123 = vmatprep.subr.mxu1 %v1844_v51  ;;  %v385_v50 = vpop.f32.mrf.mxu0  ;;  %v1926_v51 = vld [vmem:[%s3484_s3 + $0x728] sm:$0xff] }
 0x19a   :  { %2161 = vmatpush3.msra.mxu0 %v1859_v52  ;;  %2124 = vmatpush3.msra.mxu1 %v1828_v53  ;;  %v1895_v52 = vld [vmem:[%s3484_s3 + $0x630] sm:$0xff]  ;;  %v1941_v53 = vld [vmem:[%s3484_s3 + $0x7a0] sm:$0xff] }
 0x19b   :  { %2162 = vmatprep.subr.mxu0 %v1874_v54  ;;  %2125 = vmatprep.subr.mxu1 %v1843_v56  ;;  %v1910_v54 = vld [vmem:[%s3484_s3 + $0x6a8] sm:$0xff] }
 0x19c   :  { %2163 = vmatpush3.msra.mxu0 %v1858_v57  ;;  %2126 = vmatpush3.msra.mxu1 %v1827_v58  ;;  %v1894_v56 = vld [vmem:[%s3484_s3 + $0x628] sm:$0xff]  ;;  %v1940_v57 = vld [vmem:[%s3484_s3 + $0x798] sm:$0xff]  ;;  %v1909_v58 = vld [vmem:[%s3484_s3 + $0x6a0] sm:$0xff] }
 0x19d   :  { %2164 = vmatprep.subr.mxu0 %v1873_v60  ;;  %2127 = vmatprep.subr.mxu1 %v1842_v61  ;;  %v1924_v60 = vld [vmem:[%s3484_s3 + $0x718] sm:$0xff]  ;;  %v1893_v61 = vld [vmem:[%s3484_s3 + $0x620] sm:$0xff] }
 0x19e   :  { %920 = vmatprep.mubr.f32.mxu1 %v403_v59  ;;  %2165 = vmatpush3.msra.mxu0 %v1857_v63  ;;  %v389_v59 = vpop.f32.mrf.mxu0  ;;  %v1908_v63 = vld [vmem:[%s3484_s3 + $0x698] sm:$0xff] }
 0x19f   :  { %2128 = vmatpush3.msra.mxu1 %v1826_v2  ;;  %1024 = vmatprep.mubr.f32.mxu0 %v405_v62  ;;  %v1939_v62 = vld [vmem:[%s3484_s3 + $0x790] sm:$0xff] }
 0x1a0   :  { %2204 = vmatprep.subr.mxu0 %v1952_v5  ;;  %2129 = vmatprep.subr.mxu1 %v1841_v6  ;;  %v1923_v2 = vld [vmem:[%s3484_s3 + $0x710] sm:$0xff]  ;;  %v391_v5 = vpop.f32.mrf.mxu0  ;;  %v1938_v6 = vld [vmem:[%s3484_s3 + $0x788] sm:$0xff] }
 0x1a1   :  { %1025 = vmatmul.mubr.f32.vlgmr.msra.gmra.mxu0 %v404_v4  ;;  %2130 = vmatpush3.msra.mxu1 %v1825_v7  ;;  %v1892_v4 = vld [vmem:[%s3484_s3 + $0x618] sm:$0xff]  ;;  %v1907_v7 = vld [vmem:[%s3484_s3 + $0x690] sm:$0xff] }
 0x1a2   :  { %2205 = vmatpush3.msra.mxu0 %v1936_v8  ;;  %921 = vmatmul.mubr.f32.vlgmr.msra.gmra.mxu1 %v402_v9  ;;  %v407_v8 = vmax.f32 %v385_v50, 0.0  ;;  %v1922_v9 = vld [vmem:[%s3484_s3 + $0x708] sm:$0xff] }
 0x1a3   :  { %2206 = vmatprep.subr.mxu0 %v1951_v10  ;;  %2169 = vmatprep.subr.mxu1 %v1920_v11  ;;  %v1891_v10 = vld [vmem:[%s3484_s3 + $0x610] sm:$0xff]  ;;  %v1937_v11 = vld [vmem:[%s3484_s3 + $0x780] sm:$0xff] }
 0x1a4   :  { %2207 = vmatpush3.msra.mxu0 %v1935_v12  ;;  %2170 = vmatpush3.msra.mxu1 %v1904_v13  ;;  %v409_v12 = vmax.f32 %v391_v5, 0.0  ;;  %v1906_v13 = vld [vmem:[%s3484_s3 + $0x688] sm:$0xff] }
 0x1a5   :  { %2208 = vmatprep.subr.mxu0 %v1950_v14  ;;  %2171 = vmatprep.subr.mxu1 %v1919_v15  ;;  %v1921_v14 = vld [vmem:[%s3484_s3 + $0x700] sm:$0xff]  ;;  %v408_v15 = vmax.f32 %v389_v59, 0.0 }
 0x1a6   :  { %2209 = vmatpush3.msra.mxu0 %v1934_v16  ;;  %2172 = vmatpush3.msra.mxu1 %v1903_v17  ;;  %v1890_v16 = vld [vmem:[%s3484_s3 + $0x608] sm:$0xff]  ;;  %v1905_v17 = vld [vmem:[%s3484_s3 + $0x680] sm:$0xff] }
 0x1a7   :  { %2210 = vmatprep.subr.mxu0 %v1949_v18  ;;  %2173 = vmatprep.subr.mxu1 %v1918_v19  ;;  %v1889_v18 = vld [vmem:[%s3484_s3 + $0x600] sm:$0xff]  ;;  %v406_v19 = vmax.f32 %v3205_v41, 0.0 }
 0x1a8   :  { %2211 = vmatpush3.msra.mxu0 %v1933_v20  ;;  %2174 = vmatpush3.msra.mxu1 %v1902_v21  ;;  %v1275_v20 = vld [vmem:[%s3486_s5 + $0xb0] sm:$0xff]  ;;  %v1274_v21 = vld [vmem:[%s3486_s5 + $0xa8] sm:$0xff] }
 0x1a9   :  { %2212 = vmatprep.subr.mxu0 %v1948_v1  ;;  %2175 = vmatprep.subr.mxu1 %v1917_v0  ;;  %v1279_v1 = vld [vmem:[%s3486_s5 + $0xd0] sm:$0xff]  ;;  %v1268_v0 = vld [vmem:[%s3486_s5 + $0x78] sm:$0xff] }
 0x1aa   :  { %2213 = vmatpush3.msra.mxu0 %v1932_v22  ;;  %2176 = vmatpush3.msra.mxu1 %v1901_v23  ;;  %v1278_v22 = vld [vmem:[%s3486_s5 + $0xc8] sm:$0xff]  ;;  %v1267_v23 = vld [vmem:[%s3486_s5 + $0x70] sm:$0xff] }
 0x1ab   :  { %2214 = vmatprep.subr.mxu0 %v1947_v24  ;;  %2177 = vmatprep.subr.mxu1 %v1916_v25  ;;  %v1272_v24 = vld [vmem:[%s3486_s5 + $0x98] sm:$0xff]  ;;  %v1261_v25 = vld [vmem:[%s3486_s5 + $0x40] sm:$0xff] }
 0x1ac   :  { %2215 = vmatpush3.msra.mxu0 %v1931_v26  ;;  %2178 = vmatpush3.msra.mxu1 %v1900_v27  ;;  %v1271_v26 = vld [vmem:[%s3486_s5 + $0x90] sm:$0xff]  ;;  %v1260_v27 = vld [vmem:[%s3486_s5 + $0x38] sm:$0xff] }
 0x1ad   :  { %2216 = vmatprep.subr.mxu0 %v1946_v31  ;;  %2179 = vmatprep.subr.mxu1 %v1915_v32  ;;  %v1265_v31 = vld [vmem:[%s3486_s5 + $0x60] sm:$0xff]  ;;  %v1254_v32 = vld [vmem:[%s3486_s5 + $0x8] sm:$0xff] }
 0x1ae   :  { %2217 = vmatpush3.msra.mxu0 %v1930_v33  ;;  %2180 = vmatpush3.msra.mxu1 %v1899_v34  ;;  %v1264_v33 = vld [vmem:[%s3486_s5 + $0x58] sm:$0xff]  ;;  %v1258_v34 = vld [vmem:[%s3486_s5 + $0x28] sm:$0xff] }
 0x1af   :  { %2218 = vmatprep.subr.mxu0 %v1945_v35  ;;  %2181 = vmatprep.subr.mxu1 %v1914_v36  ;;  %v1253_v35 = vld [vmem:[%s3486_s5] sm:$0xff] }
 0x1b0   :  { %2219 = vmatpush3.msra.mxu0 %v1929_v37  ;;  %2182 = vmatpush3.msra.mxu1 %v1898_v38  ;;  %v1257_v36 = vld [vmem:[%s3486_s5 + $0x20] sm:$0xff] }
 0x1b1   :  { %2220 = vmatprep.subr.mxu0 %v1944_v39  ;;  %2183 = vmatprep.subr.mxu1 %v1913_v40  ;;  %v1277_v37 = vld [vmem:[%s3486_s5 + $0xc0] sm:$0xff] }
 0x1b2   :  { %2221 = vmatpush3.msra.mxu0 %v1928_v42  ;;  %2184 = vmatpush3.msra.mxu1 %v1897_v43 }
 0x1b3   :  { %2222 = vmatprep.subr.mxu0 %v1943_v44  ;;  %2185 = vmatprep.subr.mxu1 %v1912_v45 }
 0x1b4   :  { %2223 = vmatpush3.msra.mxu0 %v1927_v46  ;;  %2186 = vmatpush3.msra.mxu1 %v1896_v47 }
 0x1b5   :  { %2224 = vmatprep.subr.mxu0 %v1942_v48  ;;  %2187 = vmatprep.subr.mxu1 %v1911_v49 }
 0x1b6   :  { %2225 = vmatpush3.msra.mxu0 %v1926_v51  ;;  %2188 = vmatpush3.msra.mxu1 %v1895_v52 }
 0x1b7   :  { %2226 = vmatprep.subr.mxu0 %v1941_v53  ;;  %2189 = vmatprep.subr.mxu1 %v1910_v54 }
 0x1b8   :  { %2227 = vmatpush3.msra.mxu0 %v1925_v55  ;;  %2190 = vmatpush3.msra.mxu1 %v1894_v56 }
 0x1b9   :  { %2228 = vmatprep.subr.mxu0 %v1940_v57  ;;  %2191 = vmatprep.subr.mxu1 %v1909_v58 }
 0x1ba   :  { %2229 = vmatpush3.msra.mxu0 %v1924_v60  ;;  %2192 = vmatpush3.msra.mxu1 %v1893_v61 }
 0x1bb   :  { %2230 = vmatprep.subr.mxu0 %v1939_v62  ;;  %2193 = vmatprep.subr.mxu1 %v1908_v63 }
 0x1bc   :  { %2231 = vmatpush3.msra.mxu0 %v1923_v2  ;;  %2194 = vmatpush3.msra.mxu1 %v1892_v4 }
 0x1bd   :  { %2232 = vmatprep.subr.mxu0 %v1938_v6  ;;  %2195 = vmatprep.subr.mxu1 %v1907_v7  ;;  %v1953_v7 = vld [vmem:[%s3485_s4] ss:$0 sm:$0xff] }
 0x1be   :  { %2233 = vmatpush3.msra.mxu0 %v1922_v9  ;;  %2196 = vmatpush3.msra.mxu1 %v1891_v10 }
 0x1bf   :  { %1128 = vmatprep.mubr.f32.mxu1 %v407_v8  ;;  %2234 = vmatprep.subr.mxu0 %v1937_v11 }
 0x1c0   :  { %2197 = vmatprep.subr.mxu1 %v1906_v13  ;;  %2235 = vmatpush3.msra.mxu0 %v1921_v14  ;;  %v1276_v13 = vld [vmem:[%s3486_s5 + $0xb8] sm:$0xff] }
 0x1c1   :  { %1232 = vmatprep.mubr.f32.mxu0 %v409_v12  ;;  %2198 = vmatpush3.msra.mxu1 %v1890_v16  ;;  %v1626_v16 = vld [vmem:[%s3488_s7 + $0x78] sm:$0xff] }
 0x1c2   :  { %1233 = vmatmul.mubr.f32.vlgmr.msra.gmra.mxu0 %v408_v15  ;;  %2199 = vmatprep.subr.mxu1 %v1905_v17  ;;  %v1270_v15 = vld [vmem:[%s3486_s5 + $0x88] sm:$0xff]  ;;  %v1269_v17 = vld [vmem:[%s3486_s5 + $0x80] sm:$0xff] }
 0x1c3   :  { %2200 = vmatpush3.msra.mxu1 %v1889_v18  ;;  %1386 = vmatprep.mubr.f32.mxu0 %v2351_v3  ;;  %v1263_v18 = vld [vmem:[%s3486_s5 + $0x50] sm:$0xff] }
 0x1c4   :  { %1129 = vmatmul.mubr.f32.vlgmr.msra.gmra.mxu1 %v406_v19  ;;  %1346 = vmatprep.subr.mxu0 %v1275_v20  ;;  %v1625_v19 = vld [vmem:[%s3488_s7 + $0x70] sm:$0xff]  ;;  %v1262_v20 = vld [vmem:[%s3486_s5 + $0x48] sm:$0xff] }
 0x1c5   :  { %1528 = vmatprep.mubr.f32.mxu1 %v2351_v3  ;;  %1488 = vmatprep.subr.mxu1 %v1279_v1  ;;  %v1624_v1 = vld [vmem:[%s3488_s7 + $0x68] sm:$0xff] }
 0x1c6   :  { %1347 = vmatpush1.msra.mxu0 %v1274_v21  ;;  %1489 = vmatpush1.msra.mxu1 %v1278_v22  ;;  %v1256_v21 = vld [vmem:[%s3486_s5 + $0x18] sm:$0xff] }
 0x1c7   :  { %1348 = vmatprep.subr.mxu0 %v1268_v0  ;;  %1490 = vmatprep.subr.mxu1 %v1272_v24  ;;  %v1255_v0 = vld [vmem:[%s3486_s5 + $0x10] sm:$0xff]  ;;  %v1280_v22 = vld [vmem:[%s3486_s5 + $0xd8] sm:$0xff]  ;;  %v1273_v24 = vld [vmem:[%s3486_s5 + $0xa0] sm:$0xff] }
 0x1c8   :  { %1349 = vmatpush1.msra.mxu0 %v1267_v23  ;;  %1491 = vmatpush1.msra.mxu1 %v1271_v26  ;;  %v1623_v23 = vld [vmem:[%s3488_s7 + $0x60] sm:$0xff]  ;;  %v1266_v26 = vld [vmem:[%s3486_s5 + $0x68] sm:$0xff] }
 0x1c9   :  { %1350 = vmatprep.subr.mxu0 %v1261_v25  ;;  %1492 = vmatprep.subr.mxu1 %v1265_v31  ;;  %v1622_v25 = vld [vmem:[%s3488_s7 + $0x58] sm:$0xff]  ;;  %v1621_v31 = vld [vmem:[%s3488_s7 + $0x50] sm:$0xff] }
 0x1ca   :  { %1351 = vmatpush1.msra.mxu0 %v1260_v27  ;;  %1493 = vmatpush1.msra.mxu1 %v1264_v33  ;;  %v1259_v27 = vld [vmem:[%s3486_s5 + $0x30] sm:$0xff]  ;;  %v1619_v33 = vld [vmem:[%s3488_s7 + $0x40] sm:$0xff] }
 0x1cb   :  { %1352 = vmatprep.subr.mxu0 %v1254_v32  ;;  %1494 = vmatprep.subr.mxu1 %v1258_v34  ;;  %v1620_v32 = vld [vmem:[%s3488_s7 + $0x48] sm:$0xff]  ;;  %v1618_v34 = vld [vmem:[%s3488_s7 + $0x38] sm:$0xff] }
 0x1cc   :  { %1353 = vmatpush1.msra.mxu0 %v1253_v35  ;;  %1495 = vmatpush1.msra.mxu1 %v1257_v36  ;;  %v1617_v35 = vld [vmem:[%s3488_s7 + $0x30] sm:$0xff]  ;;  %v1616_v36 = vld [vmem:[%s3488_s7 + $0x28] sm:$0xff] }
 0x1cd   :  { %1417 = vmatprep.subr.mxu0 %v1277_v37  ;;  %2272 = vmatprep.subr.mxu1 %v2351_v3  ;;  %v1615_v37 = vld [vmem:[%s3488_s7 + $0x20] sm:$0xff] }
 0x21c   :  { %v2026_v39 = vpop.f32.mrf.mxu0 }
 0x21e   :  { %v2027_v42 = vpop.f32.mrf.mxu0 }
 0x21f   :  { %v2028_v47 = vadd.f32 %v2027_v42, %v2026_v39  ;;  %v1613_v39 = vld [vmem:[%s3488_s7 + $0x10] sm:$0xff] }
 0x220   :  { %v1991_v38 = vpop.f32.mrf.mxu1 }
 0x222   :  { %v1992_v40 = vpop.f32.mrf.mxu1 }
 0x223   :  { %v1993_v45 = vadd.f32 %v1992_v40, %v1991_v38  ;;  %v1614_v38 = vld [vmem:[%s3488_s7 + $0x18] sm:$0xff]  ;;  %v1612_v40 = vld [vmem:[%s3488_s7 + $0x8] sm:$0xff] }
 0x225   :  { %v612_v50 = vadd.f32 %v2028_v47, %v1993_v45  ;;  %v1293_v45 = vsub.s32 2, %v2498_v28 }
 0x23f   :  { %v2096_v43 = vpop.f32.mrf.mxu0 }
 0x240   :  { %v2061_v41 = vpop.f32.mrf.mxu1 }
 0x241   :  { %v2097_v49 = vpop.f32.mrf.mxu0 }
 0x242   :  { %v2062_v44 = vpop.f32.mrf.mxu1  ;;  %v2098_v54 = vadd.f32 %v2097_v49, %v2096_v43  ;;  %v1297_v43 = vsub.s32 3, %v2498_v28 }
 0x243   :  { %v2063_v48 = vadd.f32 %v2062_v44, %v2061_v41  ;;  %v1611_v41 = vld [vmem:[%s3488_s7] sm:$0xff]  ;;  %v1305_v44 = vsub.s32 5, %v2498_v28 }
 0x245   :  { %v718_v53 = vadd.f32 %v2063_v48, %v612_v50 }
 0x247   :  { %v822_v57 = vadd.f32 %v2098_v54, %v718_v53  ;;  %v1309_v54 = vsub.s32 6, %v2498_v28 }
 0x261   :  { %v2166_v51 = vpop.f32.mrf.mxu0 }
 0x262   :  { %v2131_v46 = vpop.f32.mrf.mxu1 }
 0x263   :  { %v2167_v56 = vpop.f32.mrf.mxu0 }
 0x264   :  { %v2132_v52 = vpop.f32.mrf.mxu1  ;;  %v2168_v61 = vadd.f32 %v2167_v56, %v2166_v51 }
 0x265   :  { %v2133_v55 = vadd.f32 %v2132_v52, %v2131_v46  ;;  %v1281_v46 = vld [vmem:[%s3487_s6] sm:$0xff]  ;;  %s2356_s6 = smov [#allocation2]  }
 0x266   :  { %v1298_v49 = vrot.slane %v1281_v46, %v1297_v43  ;;  %v1290_v51 = vrot.slane %v1281_v46, %v2504_v30  ;;  %v1306_v52 = vrot.slane %v1281_v46, %v1305_v44  ;;  %v1294_v53 = vrot.slane %v1281_v46, %v1293_v45  ;;  %s1705_s7 = sshll.u32 %s2356_s6, 4  ;;  %s1706_s7 = int_to_ptr.vmem [resolvable:$true] %s1705_s7 }
 0x267   :  { %v926_v59 = vadd.f32 %v2133_v55, %v822_v57  ;;  %v1286_v57 = vrot.slane %v1281_v46, %v2501_v29  ;;  %s2323_s29 = scalar_lea.vmem %s1706_s7, 32  ;;  %p2328_p1 = scmp.lt.s32.totalorder %s1706_s7, %s1706_s7 }
 0x268   :  { %p2324_p0 = scmp.ne.s32.totalorder %s1706_s7, %s2323_s29  ;;  %p2329_p2 = scmp.lt.s32.totalorder %s2323_s29, %s2323_s29 }
 0x269   :  { %v1030_v2 = vadd.f32 %v2168_v61, %v926_v59 }
 0x26a   :  { %p2330_p3 = por %p2329_p2, %p2328_p1 }
 0x26c   :  { %p2331_p4 = pnand %p2330_p3, %p2324_p0 }
 0x282   :  { %v2236_v58 = vpop.f32.mrf.mxu0 }
 0x284   :  { %v2201_v60 = vpop.f32.mrf.mxu1  ;;  %v2237_v62 = vpop.f32.mrf.mxu0 }
 0x285   :  { %v2238_v5 = vadd.f32 %v2237_v62, %v2236_v58 }
 0x286   :  { %v2202_v63 = vpop.f32.mrf.mxu1 }
 0x287   :  { %v2203_v4 = vadd.f32 %v2202_v63, %v2201_v60  ;;  %v1310_v63 = vrot.slane %v1281_v46, %v1309_v54 }
 0x289   :  { %v1134_v6 = vadd.f32 %v2203_v4, %v1030_v2 }
 0x28b   :  { %v1238_v8 = vadd.f32 %v2238_v5, %v1134_v6 }
 0x28d   :  { %v1246_v9 = vadd.f32 %v1953_v7, %v1238_v8 }
 0x28f   :  { %v1954_v10 = vmul.f32 -1.442695, %v1246_v9 }
 0x291   :  { %2319 = vpow2.f32 %v1954_v10 }
 0x29e   :  { %v2320_v11 = vpop.eup %2319 }
 0x29f   :  { %v1250_v12 = vadd.f32 1.0, %v2320_v11 }
 0x2a1   :  { %2321 = vrcp.f32 %v1250_v12 }
 0x2ae   :  { %v2322_v14 = vpop.eup %2321 }
 0x2af   :  { %1955 = vmatmul.mubr.msk.f32.vlgmr.msra.gmra.mxu0 %vm1318_vm9, %v2322_v14  ;;  %1957 = vmatmul.mubr.msk.f32.vlgmr.msra.gmra.mxu1 %vm1318_vm9, %v2322_v14 }
 0x2b0   :  { %1418 = vmatpush1.msra.mxu0 %v1276_v13  ;;  %1457 = vmatprep.mubr.f32.mxu0 %v2351_v3 }
 0x2b1   :  { %1419 = vmatprep.subr.mxu0 %v1270_v15  ;;  %2273 = vmatpush3.msra.mxu1 %v1626_v16 }
 0x2b2   :  { %1420 = vmatpush1.msra.mxu0 %v1269_v17  ;;  %2274 = vmatprep.subr.mxu1 %v2351_v3 }
 0x2b3   :  { %1421 = vmatprep.subr.mxu0 %v1263_v18  ;;  %2275 = vmatpush3.msra.mxu1 %v1625_v19 }
 0x2b4   :  { %1422 = vmatpush1.msra.mxu0 %v1262_v20  ;;  %2276 = vmatprep.subr.mxu1 %v2351_v3 }
 0x2b5   :  { %1423 = vmatprep.subr.mxu0 %v1256_v21  ;;  %2277 = vmatpush3.msra.mxu1 %v1624_v1 }
 0x2b6   :  { %1424 = vmatpush1.msra.mxu0 %v1255_v0  ;;  %2278 = vmatprep.subr.mxu1 %v2351_v3 }
 0x2b7   :  { %1956 = vmatmul.mubr.msk.f32.vlgmr.msra.gmra.mxu0 %vm1318_vm9, %v2322_v14  ;;  %2261 = vmatprep.subr.mxu0 %v2351_v3 }
 0x2b8   :  { %2262 = vmatpush3.msra.mxu0 %v1280_v22  ;;  %2269 = vmatprep.mubr.msk.f32.mxu0 %vm2355_vm10, %v2351_v3 }
 0x2b9   :  { %2263 = vmatprep.subr.mxu0 %v2351_v3  ;;  %2279 = vmatpush3.msra.mxu1 %v1623_v23 }
 0x2ba   :  { %2264 = vmatpush3.msra.mxu0 %v1273_v24  ;;  %2280 = vmatprep.subr.mxu1 %v2351_v3 }
 0x2bb   :  { %2265 = vmatprep.subr.mxu0 %v2351_v3  ;;  %2281 = vmatpush3.msra.mxu1 %v1622_v25 }
 0x2bc   :  { %2266 = vmatpush3.msra.mxu0 %v1266_v26  ;;  %2282 = vmatprep.subr.mxu1 %v2351_v3 }
 0x2bd   :  { %2267 = vmatprep.subr.mxu0 %v2351_v3  ;;  %2304 = vmatprep.mubr.msk.f32.mxu1 %vm2355_vm10, %v2351_v3 }
 0x2be   :  { %2268 = vmatpush3.msra.mxu0 %v1259_v27  ;;  %2283 = vmatpush3.msra.mxu1 %v1621_v31 }
 0x2bf   :  { %2270 = vmatmul.mubr.msk.f32.vlgmr.msra.gmra.mxu0 %vm1318_vm9, %v2322_v14  ;;  %2284 = vmatprep.subr.mxu1 %v2351_v3 }
 0x2c0   :  { %2285 = vmatpush3.msra.mxu1 %v1620_v32 }
 0x2c1   :  { %2286 = vmatprep.subr.mxu1 %v2351_v3 }
 0x2c2   :  { %2287 = vmatpush3.msra.mxu1 %v1619_v33 }
 0x2c3   :  { %2288 = vmatprep.subr.mxu1 %v2351_v3 }
 0x2c4   :  { %2289 = vmatpush3.msra.mxu1 %v1618_v34 }
 0x2c5   :  { %2290 = vmatprep.subr.mxu1 %v2351_v3 }
 0x2c6   :  { %2291 = vmatpush3.msra.mxu1 %v1617_v35 }
 0x2c7   :  { %2292 = vmatprep.subr.mxu1 %v2351_v3 }
 0x2c8   :  { %2293 = vmatpush3.msra.mxu1 %v1616_v36 }
 0x2c9   :  { %2294 = vmatprep.subr.mxu1 %v2351_v3 }
 0x2ca   :  { %2295 = vmatpush3.msra.mxu1 %v1615_v37 }
 0x2cb   :  { %2296 = vmatprep.subr.mxu1 %v2351_v3 }
 0x2cc   :  { %2297 = vmatpush3.msra.mxu1 %v1614_v38 }
 0x2cd   :  { %2298 = vmatprep.subr.mxu1 %v2351_v3 }
 0x2ce   :  { %2299 = vmatpush3.msra.mxu1 %v1613_v39 }
 0x2cf   :  { %2300 = vmatprep.subr.mxu1 %v2351_v3 }
 0x2d0   :  { %2301 = vmatpush3.msra.mxu1 %v1612_v40 }
 0x2d1   :  { %2302 = vmatprep.subr.mxu1 %v2351_v3  ;;  %v1301_v3 = vsub.s32 4, %v2498_v28 }
 0x2d2   :  { %2303 = vmatpush3.msra.mxu1 %v1611_v41 }
 0x2d3   :  { %v1302_v58 = vrot.slane %v1281_v46, %v1301_v3 }
 0x36f   :  { %v1388_v42 = vpop.f32.mrf.mxu0  ;;  %v1530_v47 = vpop.f32.mrf.mxu1 }
 0x370   :  { %v1389_v2 = vadd.f32 %v1388_v42, %v1286_v57  ;;  %v1531_v4 = vadd.f32 %v1530_v47, %v1302_v58 }
 0x371   :  { %v1390_v48 = vpop.f32.mrf.mxu0  ;;  %v1532_v55 = vpop.f32.mrf.mxu1 }
 0x372   :  { %v1391_v60 = vadd.f32 %v1390_v48, %v1290_v51  ;;  %v1533_v61 = vadd.f32 %v1532_v55, %v1306_v52 }
 0x374   :  { %v1605_v7 = vmul.f32 %v1391_v60, %v1389_v2  ;;  %v1608_v30 = vmul.f32 %v1533_v61, %v1531_v4 }
 0x377   :  { %v1459_v50 = vpop.f32.mrf.mxu0 }
 0x378   :  { %v1460_v62 = vadd.f32 %v1459_v50, %v1294_v53 }
 0x379   :  { %v1461_v56 = vpop.f32.mrf.mxu0 }
 0x37a   :  { %v1462_v59 = vadd.f32 %v1461_v56, %v1298_v49 }
 0x37c   :  { %v1606_v5 = vmul.f32 %v1462_v59, %v1460_v62 }
 0x37e   :  { %v1607_v10 = vmul.f32 %v1606_v5, %v1605_v7 }
 0x37f   :  { %v1601_v6 = vpop.f32.mrf.mxu0 }
 0x380   :  { %v1602_v8 = vadd.f32 %v1601_v6, %v1310_v63 }
 0x381   :  { %v2271_v9 = vpop.f32.mrf.mxu0 }
 0x382   :  { %v1609_v28 = vmul.f32 %v1608_v30, %v1602_v8 }
 0x384   :  { %v1610_v11 = vmul.f32 %v1609_v28, %v1607_v10 }
 0x386   :  { %2305 = vmatmul.mubr.f32.vlgmr.msra.gmra.mxu1 %v1610_v11 }
 0x446   :  { %v1693_v29 = vpop.f32.mrf.mxu1 }
 0x447   :  { %1698 = vst.msk [vmem:[#allocation2] sm:$0x3] %vm1697_vm11, %v1693_v29 }
 0x448   :  { %v2306_v12 = vpop.f32.mrf.mxu1 }
 0x449   :  { %2334 = shalt.err (!%p2331_p4)
}
 0x44a   :  { %1708 = dma.vmem_to_hbm [thread:$0]  %s1706_s7, 32, %s3489_s8, [#allocation3]  }
 0x44b   :  { %2343 = dma.done.wait [#allocation3], 32  }
 0x44c   :  { %2344 = vsyncadd [#allocation3], 4294967264 }
 0x44d   :  { %1712 = vsyncpa [#allocation3], 1 }

</bundles_post_ra>
